<compile_context>
chip_gen: v7x
topology: tpu7x:2x2x1
jax: 0.10.0
libtpu: 0.0.40
codegen_flags: <defaults>
</compile_context>

<pallas_src>
import numpy as np
import jax
import jax.numpy as jnp
from jax import lax
from jax.experimental import pallas as pl
from jax.experimental.pallas import tpu as pltpu


# ----------------------------------------------------------------------------
# Truncated real-DFT matrices (reproduce rfft / irfft restricted to the first M
# modes, default "backward" normalization).  The conjugate-pair factor-2 trick
# requires every retained mode to be strictly below N/2, i.e. M <= N // 2.
# ----------------------------------------------------------------------------
def _dft_mats(N, M):
    assert 1 <= M <= N // 2, "truncated-rDFT factor-2 trick requires 1 <= M <= N//2"
    n = np.arange(N)
    m = np.arange(M)
    ang = 2.0 * np.pi * np.outer(m, n) / N                    # (M, N)
    fcat = np.concatenate([np.cos(ang), -np.sin(ang)], axis=0)  # (2M, N): [Re; Im] rows
    c = np.where(m == 0, 1.0, 2.0)
    ang_inv = 2.0 * np.pi * np.outer(n, m) / N                # (N, M)
    gr = (c[None, :] / N) * np.cos(ang_inv)
    gi = -(c[None, :] / N) * np.sin(ang_inv)
    return (jnp.asarray(fcat, jnp.float32),
            jnp.asarray(gr, jnp.float32),
            jnp.asarray(gi, jnp.float32))


def _fused_mix_idft(gr, gi, wr, wi):
    """Fuse per-mode complex channel mixing with the inverse truncated rDFT.

    gr/gi: (N, M) inverse-DFT matrices;  wr/wi: (Cin, Cout, M) mixing weights.
    Returns B of shape (Cout*N, Cin*2*M) such that, with Xhat flattened as rows
    (c, [Re-block; Im-block] of modes), out = B @ Xhat gives rows (o, n).
    """
    br = jnp.einsum('nm,com->oncm', gr, wr) + jnp.einsum('nm,com->oncm', gi, wi)
    bi = jnp.einsum('nm,com->oncm', gi, wr) - jnp.einsum('nm,com->oncm', gr, wi)
    b = jnp.stack([br, bi], axis=3)                           # (Cout, N, Cin, 2, M)
    Cout, N, Cin, _, M = b.shape
    return b.reshape(Cout * N, Cin * 2 * M).astype(jnp.float32)


# ----------------------------------------------------------------------------
# Fused Pallas kernel: FFNOConv2d (both spectral branches) + BN_pre + DWConvFFN
# + BN_out + layer_skip residual, one grid step per batch image.
# ----------------------------------------------------------------------------
def _ffno_block_kernel(x_ref, fwb_ref, fhb_ref, bw_ref, bh_ref,
                       pre_s_ref, pre_b_ref, w1t_ref, b1_ref,
                       mid_s_ref, mid_b_ref, w3t_ref, b3_ref,
                       post_s_ref, post_b_ref, o_ref):
    x3 = x_ref[0]                                             # (C, H, W)
    C, H, W = x3.shape
    Mw2 = fwb_ref.shape[1]                                    # 2 * modes_w
    Mh2 = fhb_ref.shape[1]                                    # 2 * modes_h

    # ---- FFNOConv2d: two factorized spectral branches, fully on the MXU ----
    # Forward truncated rDFT with real & imag concatenated -> ONE batched matmul
    # per branch.  The H-direction transform contracts over H in place (no
    # transposed copy of x).
    xw = lax.dot_general(fwb_ref[...], x3,                    # (C, 2Mw, H)
                         dimension_numbers=(((2,), (2,)), ((0,), (0,))),
                         preferred_element_type=jnp.float32)
    xh = lax.dot_general(fhb_ref[...], x3,                    # (C, 2Mh, W)
                         dimension_numbers=(((2,), (1,)), ((0,), (0,))),
                         preferred_element_type=jnp.float32)

    # Per-mode complex channel mixing fused with the inverse rDFT into one dense
    # matrix per branch -> one lane-dense MXU matmul each.
    ow = jnp.dot(bw_ref[...], xw.reshape(C * Mw2, H),
                 preferred_element_type=jnp.float32)          # (C*W, H): rows (o, w')
    oh = jnp.dot(bh_ref[...], xh.reshape(C * Mh2, W),
                 preferred_element_type=jnp.float32)          # (C*H, W): rows (o, h')

    # The W-branch comes out ordered (o, w', h); reorient with C tiny 2-D XLU
    # transposes (off the MXU/VPU critical slots), then sum the branches.
    ow3 = jnp.stack([ow[o * W:(o + 1) * W, :].T for o in range(C)], axis=0)  # (C, H, W)
    f = (oh.reshape(C, H, W) + ow3).reshape(C, H * W)         # spectral out, lane-dense

    # ---- pointwise path: BN_pre -> 1x1 -> dw1x1(+BN) -> ReLU -> 1x1 -> BN ----
    # Left-multiplies keep H*W on the lane axis (unmasked lane-dense stores).
    y = x3.reshape(C, H * W)                                  # residual (layer_skip)
    h = f * pre_s_ref[...] + pre_b_ref[...]                   # BN_pre (eval, folded)
    h = jnp.dot(w1t_ref[...], h,
                preferred_element_type=jnp.float32) + b1_ref[...]   # conv1 1x1 (C->E)
    h = h * mid_s_ref[...] + mid_b_ref[...]                   # dw-1x1 conv + BN_ffn folded
    h = jnp.maximum(h, 0.0)                                   # ReLU
    z = jnp.dot(w3t_ref[...], h,
                preferred_element_type=jnp.float32) + b3_ref[...]   # conv3 1x1 (E->C)
    z = z * post_s_ref[...] + post_b_ref[...]                 # BN_out (norm), folded
    o_ref[0] = z + y                                          # layer_skip residual


def ffno2d_block_forward(x, p):
    """x: NCHW (B, C, H, W) float32 -> (B, C, H, W) float32."""
    B, C, H, W = x.shape
    Mw2 = p['fwb'].shape[1]
    Mh2 = p['fhb'].shape[1]
    E = p['w1t'].shape[0]
    full2 = lambda b: (0, 0)
    full3 = lambda b: (0, 0, 0)

    out_flat = pl.pallas_call(
        _ffno_block_kernel,
        out_shape=jax.ShapeDtypeStruct((B, C, H * W), jnp.float32),
        grid=(B,),
        in_specs=[
            pl.BlockSpec((1, C, H, W), lambda b: (b, 0, 0, 0)),   # x
            pl.BlockSpec((C, Mw2, W), full3),                     # forward DFT (W dir)
            pl.BlockSpec((C, Mh2, H), full3),                     # forward DFT (H dir)
            pl.BlockSpec((C * W, C * Mw2), full2),                # fused mix+iDFT (W dir)
            pl.BlockSpec((C * H, C * Mh2), full2),                # fused mix+iDFT (H dir)
            pl.BlockSpec((C, 1), full2),                          # BN_pre scale
            pl.BlockSpec((C, 1), full2),                          # BN_pre shift
            pl.BlockSpec((E, C), full2),                          # conv1 weight^T
            pl.BlockSpec((E, 1), full2),                          # conv1 bias
            pl.BlockSpec((E, 1), full2),                          # dw+BN_ffn scale
            pl.BlockSpec((E, 1), full2),                          # dw+BN_ffn shift
            pl.BlockSpec((C, E), full2),                          # conv3 weight^T
            pl.BlockSpec((C, 1), full2),                          # conv3 bias
            pl.BlockSpec((C, 1), full2),                          # BN_out scale
            pl.BlockSpec((C, 1), full2),                          # BN_out shift
        ],
        out_specs=pl.BlockSpec((1, C, H * W), lambda b: (b, 0, 0)),
        compiler_params=pltpu.CompilerParams(
            dimension_semantics=("parallel",)),
    )(x, p['fwb'], p['fhb'], p['bw'], p['bh'],
      p['pre_s_col'], p['pre_b_col'], p['w1t'], p['b1_col'],
      p['mid_s_col'], p['mid_b_col'], p['w3t'], p['b3_col'],
      p['post_s_col'], p['post_b_col'])
    return out_flat.reshape(B, C, H, W)


# ----------------------------------------------------------------------------
# Deterministic parameter initialization (shapes from the module __init__),
# plus the precomputed kernel-side layouts.
# ----------------------------------------------------------------------------
def init_params(key, C, H, W, n_modes):
    Mh, Mw = n_modes
    E = 2 * C                      # FFNO2dBlock.expansion = 2
    ks = jax.random.split(key, 13)

    def normal(k, shape, scale):
        return (scale * jax.random.normal(k, shape)).astype(jnp.float32)

    p = {}
    # FFNOConv2d complex weights, one per spatial dim: (C_in, C_out, modes)
    p['wr_h'] = normal(ks[0], (C, C, Mh), 1.0 / C)
    p['wi_h'] = normal(ks[1], (C, C, Mh), 1.0 / C)
    p['wr_w'] = normal(ks[2], (C, C, Mw), 1.0 / C)
    p['wi_w'] = normal(ks[3], (C, C, Mw), 1.0 / C)
    # DWConvFFN: conv1 (1x1 C->E), conv2 (depthwise 1x1 on E), conv3 (1x1 E->C)
    p['w1'] = normal(ks[4], (C, E), (1.0 / C) ** 0.5)
    p['b1'] = normal(ks[5], (E,), 0.1)
    dw_w = normal(ks[6], (E,), 1.0)
    dw_b = normal(ks[7], (E,), 0.1)
    p['w3'] = normal(ks[8], (E, C), (1.0 / E) ** 0.5)
    p['b3'] = normal(ks[9], (C,), 0.1)

    # BatchNorms (eval mode, folded to per-channel scale/shift).
    def bn(k, n, eps=1e-5):
        k1, k2, k3, k4 = jax.random.split(k, 4)
        gamma = 1.0 + 0.1 * jax.random.normal(k1, (n,))
        beta = 0.1 * jax.random.normal(k2, (n,))
        rm = 0.1 * jax.random.normal(k3, (n,))
        rv = jax.random.uniform(k4, (n,), minval=0.5, maxval=1.5)
        s = gamma / jnp.sqrt(rv + eps)
        b = beta - rm * s
        return s.astype(jnp.float32), b.astype(jnp.float32)

    p['pre_s'], p['pre_b'] = bn(ks[10], C)       # pre_norm  (BN over in_channels)
    bn2_s, bn2_b = bn(ks[11], E)                 # DWConvFFN norm (BN over E)
    p['post_s'], p['post_b'] = bn(ks[12], C)     # norm      (BN over out_channels)
    # Fold depthwise-1x1 conv into the FFN BatchNorm.
    p['mid_s'] = (dw_w * bn2_s).astype(jnp.float32)
    p['mid_b'] = (dw_b * bn2_s + bn2_b).astype(jnp.float32)

    # ---- kernel-side precomputed layouts ------------------------------------
    fcat_h, gr_h, gi_h = _dft_mats(H, Mh)
    fcat_w, gr_w, gi_w = _dft_mats(W, Mw)
    p['fhb'] = jnp.tile(fcat_h[None], (C, 1, 1))                  # (C, 2Mh, H)
    p['fwb'] = jnp.tile(fcat_w[None], (C, 1, 1))                  # (C, 2Mw, W)
    p['bh'] = _fused_mix_idft(gr_h, gi_h, p['wr_h'], p['wi_h'])   # (C*H, C*2Mh)
    p['bw'] = _fused_mix_idft(gr_w, gi_w, p['wr_w'], p['wi_w'])   # (C*W, C*2Mw)
    p['w1t'] = jnp.asarray(p['w1'].T)                             # (E, C)
    p['w3t'] = jnp.asarray(p['w3'].T)                             # (C, E)
    for name in ['pre_s', 'pre_b', 'mid_s', 'mid_b', 'post_s', 'post_b', 'b1', 'b3']:
        p[name + '_col'] = p[name].reshape(-1, 1)                 # column vecs (lanes bcast)
    return p


# ----------------------------------------------------------------------------
# Pure-JAX reference (same eval semantics) for validation.
# ----------------------------------------------------------------------------
def _ffno_conv_ref(x, p):
    B, C, H, W = x.shape
    Mh = p['wr_h'].shape[2]
    Mw = p['wr_w'].shape[2]
    hi = jax.lax.Precision.HIGHEST
    w_h = (p['wr_h'] + 1j * p['wi_h']).astype(jnp.complex64)
    w_w = (p['wr_w'] + 1j * p['wi_w']).astype(jnp.complex64)

    xft = jnp.fft.rfft(x, axis=2)
    mixed = jnp.einsum('bixw,iox->boxw', xft[:, :, :Mh, :], w_h, precision=hi)
    out_ft = jnp.zeros((B, w_h.shape[1], H // 2 + 1, W), jnp.complex64)
    out_ft = out_ft.at[:, :, :Mh, :].set(mixed)
    xx = jnp.fft.irfft(out_ft, n=H, axis=2)

    xft = jnp.fft.rfft(x, axis=3)
    mixed = jnp.einsum('bixy,ioy->boxy', xft[:, :, :, :Mw], w_w, precision=hi)
    out_ft = jnp.zeros((B, w_w.shape[1], H, W // 2 + 1), jnp.complex64)
    out_ft = out_ft.at[:, :, :, :Mw].set(mixed)
    xy = jnp.fft.irfft(out_ft, n=W, axis=3)
    return xx + xy


def ffno2d_block_reference(x, p):
    hi = jax.lax.Precision.HIGHEST
    bcast = lambda v: v[None, :, None, None]
    y = x
    f = _ffno_conv_ref(x, p)
    h = f * bcast(p['pre_s']) + bcast(p['pre_b'])
    h = jnp.einsum('bihw,io->bohw', h, p['w1'], precision=hi) + bcast(p['b1'])
    h = h * bcast(p['mid_s']) + bcast(p['mid_b'])
    h = jnp.maximum(h, 0.0)
    z = jnp.einsum('bihw,io->bohw', h, p['w3'], precision=hi) + bcast(p['b3'])
    z = z * bcast(p['post_s']) + bcast(p['post_b'])
    return z + y


if __name__ == "__main__":
    B, C, H, W = 2, 8, 16, 16
    n_modes = (8, 8)                       # retained Fourier modes per dim (<= dim//2)

    key = jax.random.PRNGKey(0)
    kx, kp = jax.random.split(key)
    x = jax.random.normal(kx, (B, C, H, W), dtype=jnp.float32)
    params = init_params(kp, C, H, W, n_modes)

    out = jax.jit(ffno2d_block_forward)(x, params)
    out = jax.block_until_ready(out)

    ref = ffno2d_block_reference(x, params)
    err = float(jnp.max(jnp.abs(out - ref)))
    scale = float(jnp.max(jnp.abs(ref)))
    assert out.shape == (B, C, H, W) and out.dtype == jnp.float32
    # Tightened from 5e-2; bound is set by the MXU's default f32 matmul precision.
    assert err / (scale + 1e-6) < 1e-2, f"mismatch vs reference: {err} (scale {scale})"
    print("KERNEL_OK")
</pallas_src>

<mosaic_0001>
module attributes {stable_mosaic.version = 11 : i64} {
  func.func @_ffno_block_kernel(%arg0: i32, %arg1: memref<1x8x16x16xf32, #tpu.memory_space<vmem>>, %arg2: memref<8x16x16xf32, #tpu.memory_space<vmem>>, %arg3: memref<8x16x16xf32, #tpu.memory_space<vmem>>, %arg4: memref<128x128xf32, #tpu.memory_space<vmem>>, %arg5: memref<128x128xf32, #tpu.memory_space<vmem>>, %arg6: memref<8x1xf32, #tpu.memory_space<vmem>>, %arg7: memref<8x1xf32, #tpu.memory_space<vmem>>, %arg8: memref<16x8xf32, #tpu.memory_space<vmem>>, %arg9: memref<16x1xf32, #tpu.memory_space<vmem>>, %arg10: memref<16x1xf32, #tpu.memory_space<vmem>>, %arg11: memref<16x1xf32, #tpu.memory_space<vmem>>, %arg12: memref<8x16xf32, #tpu.memory_space<vmem>>, %arg13: memref<8x1xf32, #tpu.memory_space<vmem>>, %arg14: memref<8x1xf32, #tpu.memory_space<vmem>>, %arg15: memref<8x1xf32, #tpu.memory_space<vmem>>, %arg16: memref<1x8x256xf32, #tpu.memory_space<vmem>>) attributes {dimension_semantics = [#tpu.dimension_semantics<parallel>], iteration_bounds = array<i64: 2>, scalar_prefetch = 0 : i64, scratch_operands = 0 : i64, tpu.core_type = #tpu.core_type<tc>, window_params = [{transform_indices = @transform_0, window_bounds = array<i64: 1, 8, 16, 16>}, {pipeline_mode = #tpu.pipeline_mode<synchronous>, transform_indices = @transform_1, window_bounds = array<i64: 8, 16, 16>}, {pipeline_mode = #tpu.pipeline_mode<synchronous>, transform_indices = @transform_2, window_bounds = array<i64: 8, 16, 16>}, {pipeline_mode = #tpu.pipeline_mode<synchronous>, transform_indices = @transform_3, window_bounds = array<i64: 128, 128>}, {pipeline_mode = #tpu.pipeline_mode<synchronous>, transform_indices = @transform_4, window_bounds = array<i64: 128, 128>}, {pipeline_mode = #tpu.pipeline_mode<synchronous>, transform_indices = @transform_5, window_bounds = array<i64: 8, 1>}, {pipeline_mode = #tpu.pipeline_mode<synchronous>, transform_indices = @transform_6, window_bounds = array<i64: 8, 1>}, {pipeline_mode = #tpu.pipeline_mode<synchronous>, transform_indices = @transform_7, window_bounds = array<i64: 16, 8>}, {pipeline_mode = #tpu.pipeline_mode<synchronous>, transform_indices = @transform_8, window_bounds = array<i64: 16, 1>}, {pipeline_mode = #tpu.pipeline_mode<synchronous>, transform_indices = @transform_9, window_bounds = array<i64: 16, 1>}, {pipeline_mode = #tpu.pipeline_mode<synchronous>, transform_indices = @transform_10, window_bounds = array<i64: 16, 1>}, {pipeline_mode = #tpu.pipeline_mode<synchronous>, transform_indices = @transform_11, window_bounds = array<i64: 8, 16>}, {pipeline_mode = #tpu.pipeline_mode<synchronous>, transform_indices = @transform_12, window_bounds = array<i64: 8, 1>}, {pipeline_mode = #tpu.pipeline_mode<synchronous>, transform_indices = @transform_13, window_bounds = array<i64: 8, 1>}, {pipeline_mode = #tpu.pipeline_mode<synchronous>, transform_indices = @transform_14, window_bounds = array<i64: 8, 1>}, {transform_indices = @transform_15, window_bounds = array<i64: 1, 8, 256>}]} {
    %c0 = arith.constant 0 : index
    %c0_0 = arith.constant 0 : index
    %c0_1 = arith.constant 0 : index
    %c0_2 = arith.constant 0 : index
    %0 = vector.load %arg1[%c0, %c0_0, %c0_1, %c0_2] : memref<1x8x16x16xf32, #tpu.memory_space<vmem>>, vector<1x8x16x16xf32>
    %1 = vector.shape_cast %0 : vector<1x8x16x16xf32> to vector<8x16x16xf32>
    %c0_3 = arith.constant 0 : index
    %c0_4 = arith.constant 0 : index
    %c0_5 = arith.constant 0 : index
    %2 = vector.load %arg2[%c0_3, %c0_4, %c0_5] : memref<8x16x16xf32, #tpu.memory_space<vmem>>, vector<8x16x16xf32>
    %cst = arith.constant dense<0.000000e+00> : vector<8x16x16xf32>
    %3 = tpu.matmul %2, %1, %cst {dimension_numbers = #tpu.dot_dimension_numbers<[2], [2], [1], [1], [0, 0, 0, 1, 1, 1], [0], [0]>} : vector<8x16x16xf32>, vector<8x16x16xf32>, vector<8x16x16xf32> -> vector<8x16x16xf32>
    %c0_6 = arith.constant 0 : index
    %c0_7 = arith.constant 0 : index
    %c0_8 = arith.constant 0 : index
    %4 = vector.load %arg3[%c0_6, %c0_7, %c0_8] : memref<8x16x16xf32, #tpu.memory_space<vmem>>, vector<8x16x16xf32>
    %cst_9 = arith.constant dense<0.000000e+00> : vector<8x16x16xf32>
    %5 = tpu.matmul %4, %1, %cst_9 {dimension_numbers = #tpu.dot_dimension_numbers<[2], [1], [1], [2], [0, 0, 0, 1, 1, 2], [0], [0]>} : vector<8x16x16xf32>, vector<8x16x16xf32>, vector<8x16x16xf32> -> vector<8x16x16xf32>
    %c0_10 = arith.constant 0 : index
    %c0_11 = arith.constant 0 : index
    %6 = vector.load %arg4[%c0_10, %c0_11] : memref<128x128xf32, #tpu.memory_space<vmem>>, vector<128x128xf32>
    %7 = vector.shape_cast %3 : vector<8x16x16xf32> to vector<128x16xf32>
    %cst_12 = arith.constant dense<0.000000e+00> : vector<128x16xf32>
    %8 = tpu.matmul %6, %7, %cst_12 {dimension_numbers = #tpu.dot_dimension_numbers<[1], [0], [0], [1], [0, 0, 1, 1], [], []>} : vector<128x128xf32>, vector<128x16xf32>, vector<128x16xf32> -> vector<128x16xf32>
    %c0_13 = arith.constant 0 : index
    %c0_14 = arith.constant 0 : index
    %9 = vector.load %arg5[%c0_13, %c0_14] : memref<128x128xf32, #tpu.memory_space<vmem>>, vector<128x128xf32>
    %10 = vector.shape_cast %5 : vector<8x16x16xf32> to vector<128x16xf32>
    %cst_15 = arith.constant dense<0.000000e+00> : vector<128x16xf32>
    %11 = tpu.matmul %9, %10, %cst_15 {dimension_numbers = #tpu.dot_dimension_numbers<[1], [0], [0], [1], [0, 0, 1, 1], [], []>} : vector<128x128xf32>, vector<128x16xf32>, vector<128x16xf32> -> vector<128x16xf32>
    %12 = vector.extract_strided_slice %8 {offsets = [0, 0], sizes = [16, 16], strides = [1, 1]} : vector<128x16xf32> to vector<16x16xf32>
    %13 = tpu.transpose %12, [1, 0] : vector<16x16xf32> -> vector<16x16xf32>
    %14 = vector.extract_strided_slice %8 {offsets = [16, 0], sizes = [16, 16], strides = [1, 1]} : vector<128x16xf32> to vector<16x16xf32>
    %15 = tpu.transpose %14, [1, 0] : vector<16x16xf32> -> vector<16x16xf32>
    %16 = vector.extract_strided_slice %8 {offsets = [32, 0], sizes = [16, 16], strides = [1, 1]} : vector<128x16xf32> to vector<16x16xf32>
    %17 = tpu.transpose %16, [1, 0] : vector<16x16xf32> -> vector<16x16xf32>
    %18 = vector.extract_strided_slice %8 {offsets = [48, 0], sizes = [16, 16], strides = [1, 1]} : vector<128x16xf32> to vector<16x16xf32>
    %19 = tpu.transpose %18, [1, 0] : vector<16x16xf32> -> vector<16x16xf32>
    %20 = vector.extract_strided_slice %8 {offsets = [64, 0], sizes = [16, 16], strides = [1, 1]} : vector<128x16xf32> to vector<16x16xf32>
    %21 = tpu.transpose %20, [1, 0] : vector<16x16xf32> -> vector<16x16xf32>
    %22 = vector.extract_strided_slice %8 {offsets = [80, 0], sizes = [16, 16], strides = [1, 1]} : vector<128x16xf32> to vector<16x16xf32>
    %23 = tpu.transpose %22, [1, 0] : vector<16x16xf32> -> vector<16x16xf32>
    %24 = vector.extract_strided_slice %8 {offsets = [96, 0], sizes = [16, 16], strides = [1, 1]} : vector<128x16xf32> to vector<16x16xf32>
    %25 = tpu.transpose %24, [1, 0] : vector<16x16xf32> -> vector<16x16xf32>
    %26 = vector.extract_strided_slice %8 {offsets = [112, 0], sizes = [16, 16], strides = [1, 1]} : vector<128x16xf32> to vector<16x16xf32>
    %27 = tpu.transpose %26, [1, 0] : vector<16x16xf32> -> vector<16x16xf32>
    %28 = vector.shape_cast %13 : vector<16x16xf32> to vector<1x16x16xf32>
    %29 = vector.shape_cast %15 : vector<16x16xf32> to vector<1x16x16xf32>
    %30 = vector.shape_cast %17 : vector<16x16xf32> to vector<1x16x16xf32>
    %31 = vector.shape_cast %19 : vector<16x16xf32> to vector<1x16x16xf32>
    %32 = vector.shape_cast %21 : vector<16x16xf32> to vector<1x16x16xf32>
    %33 = vector.shape_cast %23 : vector<16x16xf32> to vector<1x16x16xf32>
    %34 = vector.shape_cast %25 : vector<16x16xf32> to vector<1x16x16xf32>
    %35 = vector.shape_cast %27 : vector<16x16xf32> to vector<1x16x16xf32>
    %36 = tpu.concatenate %28, %29, %30, %31, %32, %33, %34, %35 in 0 : vector<1x16x16xf32>, vector<1x16x16xf32>, vector<1x16x16xf32>, vector<1x16x16xf32>, vector<1x16x16xf32>, vector<1x16x16xf32>, vector<1x16x16xf32>, vector<1x16x16xf32> -> vector<8x16x16xf32>
    %37 = vector.shape_cast %11 : vector<128x16xf32> to vector<8x16x16xf32>
    %38 = arith.addf %37, %36 : vector<8x16x16xf32>
    %39 = vector.shape_cast %38 : vector<8x16x16xf32> to vector<8x256xf32>
    %40 = vector.shape_cast %1 : vector<8x16x16xf32> to vector<8x256xf32>
    %c0_16 = arith.constant 0 : index
    %c0_17 = arith.constant 0 : index
    %41 = vector.load %arg6[%c0_16, %c0_17] : memref<8x1xf32, #tpu.memory_space<vmem>>, vector<8x1xf32>
    %42 = vector.broadcast %41 : vector<8x1xf32> to vector<8x256xf32>
    %43 = arith.mulf %39, %42 : vector<8x256xf32>
    %c0_18 = arith.constant 0 : index
    %c0_19 = arith.constant 0 : index
    %44 = vector.load %arg7[%c0_18, %c0_19] : memref<8x1xf32, #tpu.memory_space<vmem>>, vector<8x1xf32>
    %45 = vector.broadcast %44 : vector<8x1xf32> to vector<8x256xf32>
    %46 = arith.addf %43, %45 : vector<8x256xf32>
    %c0_20 = arith.constant 0 : index
    %c0_21 = arith.constant 0 : index
    %47 = vector.load %arg8[%c0_20, %c0_21] : memref<16x8xf32, #tpu.memory_space<vmem>>, vector<16x8xf32>
    %cst_22 = arith.constant dense<0.000000e+00> : vector<16x256xf32>
    %48 = tpu.matmul %47, %46, %cst_22 {dimension_numbers = #tpu.dot_dimension_numbers<[1], [0], [0], [1], [0, 0, 1, 1], [], []>} : vector<16x8xf32>, vector<8x256xf32>, vector<16x256xf32> -> vector<16x256xf32>
    %c0_23 = arith.constant 0 : index
    %c0_24 = arith.constant 0 : index
    %49 = vector.load %arg9[%c0_23, %c0_24] : memref<16x1xf32, #tpu.memory_space<vmem>>, vector<16x1xf32>
    %50 = vector.broadcast %49 : vector<16x1xf32> to vector<16x256xf32>
    %51 = arith.addf %48, %50 : vector<16x256xf32>
    %c0_25 = arith.constant 0 : index
    %c0_26 = arith.constant 0 : index
    %52 = vector.load %arg10[%c0_25, %c0_26] : memref<16x1xf32, #tpu.memory_space<vmem>>, vector<16x1xf32>
    %53 = vector.broadcast %52 : vector<16x1xf32> to vector<16x256xf32>
    %54 = arith.mulf %51, %53 : vector<16x256xf32>
    %c0_27 = arith.constant 0 : index
    %c0_28 = arith.constant 0 : index
    %55 = vector.load %arg11[%c0_27, %c0_28] : memref<16x1xf32, #tpu.memory_space<vmem>>, vector<16x1xf32>
    %56 = vector.broadcast %55 : vector<16x1xf32> to vector<16x256xf32>
    %57 = arith.addf %54, %56 : vector<16x256xf32>
    %cst_29 = arith.constant 0.000000e+00 : f32
    %58 = vector.broadcast %cst_29 : f32 to vector<16x256xf32>
    %59 = arith.maximumf %57, %58 : vector<16x256xf32>
    %c0_30 = arith.constant 0 : index
    %c0_31 = arith.constant 0 : index
    %60 = vector.load %arg12[%c0_30, %c0_31] : memref<8x16xf32, #tpu.memory_space<vmem>>, vector<8x16xf32>
    %cst_32 = arith.constant dense<0.000000e+00> : vector<8x256xf32>
    %61 = tpu.matmul %60, %59, %cst_32 {dimension_numbers = #tpu.dot_dimension_numbers<[1], [0], [0], [1], [0, 0, 1, 1], [], []>} : vector<8x16xf32>, vector<16x256xf32>, vector<8x256xf32> -> vector<8x256xf32>
    %c0_33 = arith.constant 0 : index
    %c0_34 = arith.constant 0 : index
    %62 = vector.load %arg13[%c0_33, %c0_34] : memref<8x1xf32, #tpu.memory_space<vmem>>, vector<8x1xf32>
    %63 = vector.broadcast %62 : vector<8x1xf32> to vector<8x256xf32>
    %64 = arith.addf %61, %63 : vector<8x256xf32>
    %c0_35 = arith.constant 0 : index
    %c0_36 = arith.constant 0 : index
    %65 = vector.load %arg14[%c0_35, %c0_36] : memref<8x1xf32, #tpu.memory_space<vmem>>, vector<8x1xf32>
    %66 = vector.broadcast %65 : vector<8x1xf32> to vector<8x256xf32>
    %67 = arith.mulf %64, %66 : vector<8x256xf32>
    %c0_37 = arith.constant 0 : index
    %c0_38 = arith.constant 0 : index
    %68 = vector.load %arg15[%c0_37, %c0_38] : memref<8x1xf32, #tpu.memory_space<vmem>>, vector<8x1xf32>
    %69 = vector.broadcast %68 : vector<8x1xf32> to vector<8x256xf32>
    %70 = arith.addf %67, %69 : vector<8x256xf32>
    %71 = arith.addf %70, %40 : vector<8x256xf32>
    %c0_39 = arith.constant 0 : index
    %c0_40 = arith.constant 0 : index
    %c0_41 = arith.constant 0 : index
    %72 = vector.load %arg16[%c0_39, %c0_40, %c0_41] : memref<1x8x256xf32, #tpu.memory_space<vmem>>, vector<1x8x256xf32>
    %73 = vector.shape_cast %72 : vector<1x8x256xf32> to vector<8x256xf32>
    %74 = vector.shape_cast %71 : vector<8x256xf32> to vector<1x8x256xf32>
    tpu.vector_store %arg16[%c0_39, %c0_40, %c0_41], %74 {strides = array<i32>} : memref<1x8x256xf32, #tpu.memory_space<vmem>>, vector<1x8x256xf32>,
    return
  }
  func.func @transform_0(%arg0: i32) -> (i32, i32, i32, i32) {
    %c0_i32 = arith.constant 0 : i32
    %c0_i32_0 = arith.constant 0 : i32
    %c0_i32_1 = arith.constant 0 : i32
    %c0_i32_2 = arith.constant 0 : i32
    return %arg0, %c0_i32, %c0_i32_0, %c0_i32_1 : i32, i32, i32, i32
  }
  func.func @transform_1(%arg0: i32) -> (i32, i32, i32) {
    %c0_i32 = arith.constant 0 : i32
    %c0_i32_0 = arith.constant 0 : i32
    %c0_i32_1 = arith.constant 0 : i32
    %c0_i32_2 = arith.constant 0 : i32
    return %c0_i32, %c0_i32_0, %c0_i32_1 : i32, i32, i32
  }
  func.func @transform_2(%arg0: i32) -> (i32, i32, i32) {
    %c0_i32 = arith.constant 0 : i32
    %c0_i32_0 = arith.constant 0 : i32
    %c0_i32_1 = arith.constant 0 : i32
    %c0_i32_2 = arith.constant 0 : i32
    return %c0_i32, %c0_i32_0, %c0_i32_1 : i32, i32, i32
  }
  func.func @transform_3(%arg0: i32) -> (i32, i32) {
    %c0_i32 = arith.constant 0 : i32
    %c0_i32_0 = arith.constant 0 : i32
    %c0_i32_1 = arith.constant 0 : i32
    return %c0_i32, %c0_i32_0 : i32, i32
  }
  func.func @transform_4(%arg0: i32) -> (i32, i32) {
    %c0_i32 = arith.constant 0 : i32
    %c0_i32_0 = arith.constant 0 : i32
    %c0_i32_1 = arith.constant 0 : i32
    return %c0_i32, %c0_i32_0 : i32, i32
  }
  func.func @transform_5(%arg0: i32) -> (i32, i32) {
    %c0_i32 = arith.constant 0 : i32
    %c0_i32_0 = arith.constant 0 : i32
    %c0_i32_1 = arith.constant 0 : i32
    return %c0_i32, %c0_i32_0 : i32, i32
  }
  func.func @transform_6(%arg0: i32) -> (i32, i32) {
    %c0_i32 = arith.constant 0 : i32
    %c0_i32_0 = arith.constant 0 : i32
    %c0_i32_1 = arith.constant 0 : i32
    return %c0_i32, %c0_i32_0 : i32, i32
  }
  func.func @transform_7(%arg0: i32) -> (i32, i32) {
    %c0_i32 = arith.constant 0 : i32
    %c0_i32_0 = arith.constant 0 : i32
    %c0_i32_1 = arith.constant 0 : i32
    return %c0_i32, %c0_i32_0 : i32, i32
  }
  func.func @transform_8(%arg0: i32) -> (i32, i32) {
    %c0_i32 = arith.constant 0 : i32
    %c0_i32_0 = arith.constant 0 : i32
    %c0_i32_1 = arith.constant 0 : i32
    return %c0_i32, %c0_i32_0 : i32, i32
  }
  func.func @transform_9(%arg0: i32) -> (i32, i32) {
    %c0_i32 = arith.constant 0 : i32
    %c0_i32_0 = arith.constant 0 : i32
    %c0_i32_1 = arith.constant 0 : i32
    return %c0_i32, %c0_i32_0 : i32, i32
  }
  func.func @transform_10(%arg0: i32) -> (i32, i32) {
    %c0_i32 = arith.constant 0 : i32
    %c0_i32_0 = arith.constant 0 : i32
    %c0_i32_1 = arith.constant 0 : i32
    return %c0_i32, %c0_i32_0 : i32, i32
  }
  func.func @transform_11(%arg0: i32) -> (i32, i32) {
    %c0_i32 = arith.constant 0 : i32
    %c0_i32_0 = arith.constant 0 : i32
    %c0_i32_1 = arith.constant 0 : i32
    return %c0_i32, %c0_i32_0 : i32, i32
  }
  func.func @transform_12(%arg0: i32) -> (i32, i32) {
    %c0_i32 = arith.constant 0 : i32
    %c0_i32_0 = arith.constant 0 : i32
    %c0_i32_1 = arith.constant 0 : i32
    return %c0_i32, %c0_i32_0 : i32, i32
  }
  func.func @transform_13(%arg0: i32) -> (i32, i32) {
    %c0_i32 = arith.constant 0 : i32
    %c0_i32_0 = arith.constant 0 : i32
    %c0_i32_1 = arith.constant 0 : i32
    return %c0_i32, %c0_i32_0 : i32, i32
  }
  func.func @transform_14(%arg0: i32) -> (i32, i32) {
    %c0_i32 = arith.constant 0 : i32
    %c0_i32_0 = arith.constant 0 : i32
    %c0_i32_1 = arith.constant 0 : i32
    return %c0_i32, %c0_i32_0 : i32, i32
  }
  func.func @transform_15(%arg0: i32) -> (i32, i32, i32) {
    %c0_i32 = arith.constant 0 : i32
    %c0_i32_0 = arith.constant 0 : i32
    %c0_i32_1 = arith.constant 0 : i32
    return %arg0, %c0_i32, %c0_i32_0 : i32, i32, i32
  }
}

</mosaic_0001>

<bundles_post_ra>
// kernel: ffno2d_block_forward.1
= control target key start
LH: loop header
LB: loop body
LE: loop exit
PB: predicated region body
PF: predicated region fallthrough
CT: control target
= control target key end

     0   :  { %s5203_s0 = inlined_call_operand.hbm [shape: f32[2,8,16,16], index: 0, kind: input, shape index: {}]   ;;  %s5204_s1 = inlined_call_operand.vmem [shape: f32[8,16,16], index: 1, kind: input, shape index: {}]   ;;  %s5205_s2 = inlined_call_operand.hbm [shape: f32[8,16,16], index: 2, kind: input, shape index: {}]   ;;  %s5206_s3 = inlined_call_operand.hbm [shape: f32[128,128], index: 3, kind: input, shape index: {}]   ;;  %s5207_s4 = inlined_call_operand.hbm [shape: f32[128,128], index: 4, kind: input, shape index: {}]   ;;  %s5208_s5 = inlined_call_operand.vmem [shape: f32[8,1], index: 5, kind: input, shape index: {}]   ;;  %s5209_s6 = inlined_call_operand.vmem [shape: f32[8,1], index: 6, kind: input, shape index: {}]   ;;  %s5210_s7 = inlined_call_operand.vmem [shape: f32[16,8], index: 7, kind: input, shape index: {}]   ;;  %s5211_s8 = inlined_call_operand.vmem [shape: f32[16,1], index: 8, kind: input, shape index: {}]   ;;  %s5212_s9 = inlined_call_operand.vmem [shape: f32[16,1], index: 9, kind: input, shape index: {}]   ;;  %s5213_s10 = inlined_call_operand.vmem [shape: f32[16,1], index: 10, kind: input, shape index: {}]   ;;  %s5214_s11 = inlined_call_operand.vmem [shape: f32[8,16], index: 11, kind: input, shape index: {}]   ;;  %s5215_s12 = inlined_call_operand.vmem [shape: f32[8,1], index: 12, kind: input, shape index: {}]   ;;  %s5216_s13 = inlined_call_operand.vmem [shape: f32[8,1], index: 13, kind: input, shape index: {}]   ;;  %s5217_s14 = inlined_call_operand.vmem [shape: f32[8,1], index: 14, kind: input, shape index: {}]   ;;  %s5218_s15 = inlined_call_operand.vmem [shape: f32[2,8,256], index: 15, kind: output, shape index: {}]  }
   0x1   :  { %5232 = sst [smem:[#allocation12_spill]] %s5210_s7 }
   0x2   :  { %5233 = sst [smem:[#allocation13_spill]] %s5213_s10 }
   0x3   :  { %5234 = sst [smem:[#allocation14_spill]] %s5214_s11 }
   0x4   :  { %5235 = sst [smem:[#allocation15_spill]] %s5215_s12 }
   0x5   :  { %5236 = sst [smem:[#allocation16_spill]] %s5216_s13 }
   0x6   :  { %5237 = sst [smem:[#allocation17_spill]] %s5217_s14 }
   0x7   :  { %5238 = sst [smem:[#allocation18_spill]] %s5218_s15 }
   0x8   :  { %20 = vsyncpa [#allocation3], 0 }
   0x9   :  { %22 = vsyncpa [#allocation3 + $0x1], 0 }
   0xa   :  { %23 = vsyncpa [#allocation5], 0 }
   0xb   :  { %24 = vsyncpa [#allocation8], 0  ;;  %s4510_s18 = smov 0   ;;  %s4512_s19 = smov 0  }
   0xc   :  { %s4514_s20 = smov 0   ;;  %s4516_s21 = smov 0  }
   0xd LB: > { %s4529_s22 = sadd.s32 4294967295, %s4411_s21   ;;  %p50_p0 = scmp.ne.s32.totalorder %s4403_s19, %s4399_s18  ;;  %s4411_s21 = sphi %s4516_s21, %s5266_s21   ;;  %s4407_s20 = sphi %s4514_s20, %s5265_s20   ;;  %s4403_s19 = sphi %s4512_s19, %s5264_s19   ;;  %s4399_s18 = sphi %s4510_s18, %s5263_s18  }
   0xe   : > { %p5220_p1 = scmp.eq.s32.totalorder %s4529_s22, 0  ;;  %p3584_p2 = scmp.ge.s32.totalorder %s4411_s21, 1 }
   0xf   : > { %p381_p3 = scmp.lt.s32.totalorder %s4411_s21, 3  ;;  %s4413_s25 = smov [#allocation4]  }
  0x10   : > { %p4537_p4 = por %p5220_p1, %p50_p0  ;;  %s396_s26 = sshll.u32 %s4413_s25, 4  ;;  %s4545_s26 = int_to_ptr.vmem [resolvable:$true] %s396_s26 }
  0x11   : > { %p4541_p5 = pnand %p3584_p2, %p381_p3  ;;  %s4414_s28 = smov [#allocation6]  }
  0x12   : > { %s5239_s23 = scalar_select %p4537_p4, 1, 0 }
  0x13   : > { %s5240_s24 = scalar_select %p4541_p5, 1, 0 }
  0x14   : > { %p4168_p6 = pneg %p4541_p5  ;;  %s409_s29 = sshll.u32 %s4414_s28, 4  ;;  %s4555_s29 = int_to_ptr.vmem [resolvable:$true] %s409_s29 }
  0x15   : > { %s4415_s30 = smov [#allocation7]   ;;  %s4255_s25 = scalar_lea.hbm %s5205_s2, 2048 }
  0x16   : > { %p4551_p7 = pnand %p4168_p6, %p5220_p1  ;;  %s4557_s16 = sshll.u32 %s4415_s30, 4  ;;  %s423_s16 = int_to_ptr.vmem [resolvable:$true] %s4557_s16 }
  0x17   : > { %p4256_p8 = scmp.ne.s32.totalorder %s5205_s2, %s4255_s25  ;;  %p4262_p12 = scmp.lt.u32.totalorder %s4255_s25, %s5205_s2 }
  0x18   : > { %p4567_p9 = pneg %p4551_p7 }
  0x1a   : > { %p4258_p10 = pnand %p4567_p9, %p4256_p8 }
  0x1c   : > { %p4259_p11 = pneg %p4258_p10 }
  0x1e   : > { %p4264_p13 = pnand %p4262_p12, %p4259_p11 }
  0x20   : > { %4267 = shalt.err (!%p4264_p13)
}
  0x21   : > { %s4268_s11 = scalar_lea.vmem %s4545_s26, 2048  ;;  %p4276_p6 = scmp.lt.s32.totalorder %s4545_s26, %s4545_s26 }
  0x22   : > { %p4269_p0 = scmp.ne.s32.totalorder %s4545_s26, %s4268_s11  ;;  %p4277_p1 = scmp.lt.s32.totalorder %s4268_s11, %s4268_s11 }
  0x24   : > { %p4271_p2 = pnand %p4269_p0, %p4567_p9  ;;  %p4278_p8 = por %p4277_p1, %p4276_p6 }
  0x26   : > { %p4272_p3 = pneg %p4271_p2 }
  0x28   : > { %p4279_p10 = pnand %p4278_p8, %p4272_p3 }
  0x2a   : > { %4282 = shalt.err (!%p4279_p10)
}
  0x2b   : > { %s4416_s15 = smov 128   ;;  %s4417_s17 = smov 8  }
  0x2c   : > { %4171 = dma.hbm_to_vmem [thread:$0]  (!%p4551_p7), %s5205_s2, 2048, %s4545_s26, [#allocation5], %s4416_s15, %s4416_s15, %s4417_s17  }
  0x2d   : > { %s4283_s11 = scalar_lea.hbm %s5206_s3, 2048 }
  0x2e   : > { %p4284_p1 = scmp.ne.s32.totalorder %s5206_s3, %s4283_s11  ;;  %p4290_p13 = scmp.lt.u32.totalorder %s4283_s11, %s5206_s3 }
  0x30   : > { %p4286_p11 = pnand %p4284_p1, %p4567_p9 }
  0x32   : > { %p4287_p12 = pneg %p4286_p11 }
  0x34   : > { %p4292_p0 = pnand %p4290_p13, %p4287_p12 }
  0x36   : > { %4295 = shalt.err (!%p4292_p0)
}
  0x37   : > { %s4296_s26 = scalar_lea.vmem %s4555_s29, 2048  ;;  %p4304_p8 = scmp.lt.s32.totalorder %s4555_s29, %s4555_s29 }
  0x38   : > { %p4297_p2 = scmp.ne.s32.totalorder %s4555_s29, %s4296_s26  ;;  %p4305_p10 = scmp.lt.s32.totalorder %s4296_s26, %s4296_s26 }
  0x3a   : > { %p4299_p3 = pnand %p4297_p2, %p4567_p9  ;;  %p4306_p1 = por %p4305_p10, %p4304_p8 }
  0x3c   : > { %p4300_p6 = pneg %p4299_p3 }
  0x3e   : > { %p4307_p11 = pnand %p4306_p1, %p4300_p6 }
  0x40   : > { %4310 = shalt.err (!%p4307_p11)
}
  0x41   : > { %4174 = dma.hbm_to_vmem [thread:$0]  (!%p4551_p7), %s5206_s3, 2048, %s4555_s29, [#allocation5], %s4416_s15, %s4416_s15, %s4417_s17  }
  0x42   : > { %s4311_s18 = scalar_lea.hbm %s5207_s4, 2048 }
  0x43   : > { %p4312_p12 = scmp.ne.s32.totalorder %s5207_s4, %s4311_s18  ;;  %p4318_p2 = scmp.lt.u32.totalorder %s4311_s18, %s5207_s4 }
  0x45   : > { %p4314_p13 = pnand %p4312_p12, %p4567_p9 }
  0x47   : > { %p4315_p0 = pneg %p4314_p13 }
  0x49   : > { %p4320_p3 = pnand %p4318_p2, %p4315_p0 }
  0x4b   : > { %4323 = shalt.err (!%p4320_p3)
}
  0x4c   : > { %s4324_s26 = scalar_lea.vmem %s423_s16, 2048  ;;  %p4332_p1 = scmp.lt.s32.totalorder %s423_s16, %s423_s16 }
  0x4d   : > { %p4325_p6 = scmp.ne.s32.totalorder %s423_s16, %s4324_s26  ;;  %p4333_p11 = scmp.lt.s32.totalorder %s4324_s26, %s4324_s26 }
  0x4f   : > { %p4327_p8 = pnand %p4325_p6, %p4567_p9  ;;  %p4334_p4 = por %p4333_p11, %p4332_p1 }
  0x51   : > { %p4328_p10 = pneg %p4327_p8 }
  0x53   : > { %p4335_p5 = pnand %p4334_p4, %p4328_p10 }
  0x55   : > { %4338 = shalt.err (!%p4335_p5)
}
  0x56   : > { %4177 = dma.hbm_to_vmem [thread:$0]  (!%p4551_p7), %s5207_s4, 2048, %s423_s16, [#allocation8], %s4416_s15, %s4416_s15, %s4417_s17  }
  0x57   : > { %s4640_s7 = sadd.s32 1, %s4411_s21   ;;  %s37_s12 = sadd.s32 1, %s4407_s20 }
  0x58   : > { %s34_s27 = ssub.s32 %s4411_s21, %s4640_s7  ;;  %p44_p5 = scmp.ne.s32.totalorder %s4407_s20, %s4403_s19 }
  0x59   : > { %p35_p4 = scmp.eq.s32.totalorder %s34_s27, 0  ;;  %p45_p9 = scmp.eq.s32.totalorder %s4411_s21, 0 }
  0x5a   : > { %p4185_p12 = scmp.lt.s32.totalorder %s4411_s21, 2  ;;  %s466_s14 = sand.u32 1, %s4407_s20  }
  0x5b   : > { %s4650_s13 = scalar_select %p35_p4, %s4407_s20, %s37_s12  }
  0x5c   : > { %p46_p13 = por %p45_p9, %p44_p5  ;;  %s3589_s18 = sshll.u32 %s466_s14, 7 }
  0x5d   : > { %s3652_s25 = sshll.u32 %s4411_s21, 11  ;;  %s470_s16 = scalar_lea.vmem [#allocation2], %s3589_s18 }
  0x5e   : > { %s4657_s11 = scalar_lea.hbm %s5203_s0, %s3652_s25  ;;  %s477_s26 = sshll.u32 %s470_s16, 4  ;;  %s4659_s26 = int_to_ptr.vmem [resolvable:$true] %s477_s26 }
  0x5f   : > { %p4661_p7 = pnand %p4185_p12, %p46_p13  ;;  %s4665_s21 = scalar_lea.sflag [#allocation3], %s466_s14 }
  0x60   : > { %s4339_s10 = scalar_lea.hbm %s4657_s11, 2048  ;;  %s4344_s18 = scalar_lea.hbm %s5203_s0, 4096 }
  0x61   : > { %p4340_p0 = scmp.ne.s32.totalorder %s4657_s11, %s4339_s10  ;;  %p4341_p2 = pneg %p4661_p7 }
  0x62   : > { %p4345_p8 = scmp.lt.u32.totalorder %s4657_s11, %s5203_s0  ;;  %p4346_p10 = scmp.lt.u32.totalorder %s4344_s18, %s4339_s10 }
  0x63   : > { %p4342_p3 = pnand %p4341_p2, %p4340_p0  ;;  %p4348_p11 = scmp.lt.u32.totalorder %s4339_s10, %s4657_s11 }
  0x64   : > { %p4347_p1 = por %p4346_p10, %p4345_p8 }
  0x65   : > { %p4343_p6 = pneg %p4342_p3 }
  0x66   : > { %p4349_p4 = por %p4348_p11, %p4347_p1 }
  0x68   : > { %p4350_p5 = pnand %p4349_p4, %p4343_p6 }
  0x6a   : > { %4353 = shalt.err (!%p4350_p5)
}
  0x6b   : > { %s4354_s14 = scalar_lea.vmem %s4659_s26, 2048  ;;  %s4418_s30 = smov [#allocation2]  }
  0x6c   : > { %p4355_p9 = scmp.ne.s32.totalorder %s4659_s26, %s4354_s14  ;;  %s4359_s16 = sshll.u32 %s4418_s30, 4  ;;  %s4360_s16 = int_to_ptr.vmem [resolvable:$false] %s4359_s16 }
  0x6d   : > { %s4361_s27 = scalar_lea.vmem %s4360_s16, 4096  ;;  %p4362_p0 = scmp.lt.s32.totalorder %s4659_s26, %s4360_s16 }
  0x6e   : > { %p4357_p12 = pnand %p4355_p9, %p4341_p2  ;;  %p4363_p3 = scmp.lt.s32.totalorder %s4361_s27, %s4354_s14 }
  0x70   : > { %p4358_p13 = pneg %p4357_p12  ;;  %p4364_p8 = por %p4363_p3, %p4362_p0 }
  0x72   : > { %p4365_p10 = pnand %p4364_p8, %p4358_p13 }
  0x74   : > { %4368 = shalt.err (!%p4365_p10)
}
  0x75   : > { %4181 = dma.hbm_to_vmem [thread:$0]  (!%p4661_p7), %s4657_s11, 2048, %s4659_s26, %s4665_s21, %s4416_s15, %s4416_s15, %s4417_s17  }
  0x76   : > { %p5244_p2 = scmp.ne.s32.totalorder %s5240_s24, 0 }
  0x77   : > { %s491_s10 = sand.u32 (!%p5244_p2), 1, %s4403_s19   ;;  %p5245_p6 = scmp.ne.s32.totalorder (!%p5244_p2), %s5239_s23, 0 }
  0x78   : > { %489 = sbr.rel (%p5244_p2) target bundleno = 1373 (0x55d), region = 80  ;;  %s3593_s12 = sshll.u32 (!%p5244_p2), %s491_s10, 7 }
  0x79   : > { %s492_s18 = scalar_lea.sflag (!%p5244_p2), [#allocation3], %s491_s10  ;;  %s4699_s25 = scalar_lea.vmem (!%p5244_p2), [#allocation2], %s3593_s12 }
  0x7f   : > { %4386 = dma.done.wait (%p5245_p6), %s492_s18, 2048  }
  0x80   : > { %4388 = vsyncadd (%p5245_p6), %s492_s18, 4294965248  ;;  %p5246_p1 = scmp.eq.s32.totalorder %s4529_s22, 0 }
  0x82   : > { %4390 = dma.done.wait (%p5246_p1), [#allocation5], 4096   ;;  %p5247_p7 = pmov %p5246_p1 }
  0x83   : > { %p5248_p11 = pmov %p5246_p1 }
  0x84   : > { %4392 = vsyncadd (%p5247_p7), [#allocation5], 4294963200 }
  0x85   : > { %4394 = dma.done.wait (%p5248_p11), [#allocation8], 2048   ;;  %p5249_p4 = pmov %p5246_p1 }
  0x86   : > { %vm591_vm0 = vcmask 130048   ;;  %v559_v1 = vld [vmem:[%s4699_s25] sm:$0xff]  ;;  %v560_v2 = vld [vmem:[%s4699_s25 + $0x8] sm:$0xff]  ;;  %v561_v3 = vld [vmem:[%s4699_s25 + $0x10] sm:$0xff]  ;;  %v4419_v60 = vmov 0   ;;  %s4422_s11 = smov 48  }
  0x87   : > { %4396 = vsyncadd (%p5249_p4), [#allocation8], 4294965248  ;;  %v4722_v4 = vpack.c.bf16 %v560_v2, %v559_v1  ;;  %v562_v5 = vld [vmem:[%s4699_s25 + $0x18] sm:$0xff]  ;;  %v575_v6 = vld [vmem:[%s5204_s1] sm:$0xff]  ;;  %4237 = vset.pattern.permute.xlu1 %v4419_v60  ;;  %s4423_s26 = smov 16   ;;  %s5230_s29 = smov 64  }
  0x88   : > { %vm4715_vm1 = vmpackc.low %vm591_vm0, %vm591_vm0  ;;  %v4728_v7 = vpack.c.bf16 %v562_v5, %v561_v3  ;;  %3786 = vmatprep.mubr.msk.f32.mxu0 %vm591_vm0, %v575_v6  ;;  %v563_v8 = vld [vmem:[%s4699_s25 + $0x20] sm:$0xff]  ;;  %v564_v9 = vld [vmem:[%s4699_s25 + $0x28] sm:$0xff]  ;;  %s4425_s21 = smov 32   ;;  %s5228_s28 = smov 80   ;;  %vm2875_vm2 = vcmask 261120   ;;  %vm2877_vm3 = vcmask 392192  }
  0x89   : > { %v577_v10 = vld [vmem:[%s5204_s1 + $0x10] sm:$0xff]  ;;  %4008 = vmatprep.subr.msk.bf16.mxu0 %vm4715_vm1, %v4722_v4  ;;  %v4739_v11 = vpack.c.bf16 %v564_v9, %v563_v8  ;;  %v566_v13 = vld [vmem:[%s4699_s25 + $0x38] sm:$0xff]  ;;  %v4762_v15 = vld [vmem:[%s4699_s25 + $0x40] sm:$0xff]  ;;  %s5226_s14 = smov 96   ;;  %s5224_s30 = smov 112   ;;  %vm2879_vm4 = vcmask 523264  }
  0x8a   : > { %3793 = vmatprep.mubr.msk.f32.mxu1 %vm591_vm0, %v577_v10  ;;  %v565_v12 = vld [vmem:[%s4699_s25 + $0x30] sm:$0xff]  ;;  %4011 = vmatpush3.bf16.xpose.msk.msra.mxu0 %vm4715_vm1, %v4722_v4  ;;  %v568_v16 = vld [vmem:[%s4699_s25 + $0x48] sm:$0xff]  ;;  %v570_v19 = vld [vmem:[%s4699_s25 + $0x58] sm:$0xff]  ;;  %s5252_s17 = sld [smem:[#allocation13_spill]]  ;;  %s5253_s16 = sld [smem:[#allocation16_spill]]  ;;  %vm2881_vm5 = vcmask 654336  }
  0x8b   : > { %4014 = vmatprep.subr.msk.bf16.mxu1 %vm4715_vm1, %v4728_v7  ;;  %v4750_v14 = vpack.c.bf16 %v566_v13, %v565_v12  ;;  %4020 = vmatprep.subr.msk.bf16.mxu0 %vm4715_vm1, %v4739_v11  ;;  %v576_v17 = vld [vmem:[%s5204_s1 + $0x8] sm:$0xff]  ;;  %v4769_v18 = vld [vmem:[%s4699_s25 + $0x50] sm:$0xff]  ;;  %v578_v20 = vld [vmem:[%s5204_s1 + $0x18] sm:$0xff]  ;;  %v4779_v22 = vpack.c.bf16 %v568_v16, %v4762_v15  ;;  %s5254_s24 = sld [smem:[#allocation15_spill]]  ;;  %vm2883_vm6 = vcmask 785408   ;;  %vm2885_vm7 = vcmask 916480  }
  0x8c   : > { %4017 = vmatpush3.bf16.xpose.msk.msra.mxu1 %vm4715_vm1, %v4728_v7  ;;  %v579_v21 = vld [vmem:[%s5204_s1 + $0x20] sm:$0xff]  ;;  %v581_v23 = vld [vmem:[%s5204_s1 + $0x30] sm:$0xff]  ;;  %v4786_v24 = vpack.c.bf16 %v570_v19, %v4769_v18  ;;  %v4807_v26 = vld [vmem:[%s4699_s25 + $0x68] sm:$0xff]  ;;  %vm3266_vm8 = vcmask 64512   ;;  %s5261_s18 = sld [smem:[#allocation14_spill]]  ;;  %p554_p5 = scmp.lt.s32.totalorder %s4529_s22, 1 }
  0x8d   : > { %4026 = vmatprep.subr.msk.bf16.mxu1 %vm4715_vm1, %v4750_v14  ;;  %v4804_v25 = vld [vmem:[%s4699_s25 + $0x60] sm:$0xff]  ;;  %v580_v27 = vld [vmem:[%s5204_s1 + $0x28] sm:$0xff]  ;;  %v4813_v28 = vld [vmem:[%s4699_s25 + $0x70] sm:$0xff] }
  0x8e   : > { %v4816_v29 = vld [vmem:[%s4699_s25 + $0x78] sm:$0xff]  ;;  %v583_v31 = vld [vmem:[%s5204_s1 + $0x40] sm:$0xff]  ;;  %v4826_v32 = vpack.c.bf16 %v4807_v26, %v4804_v25  ;;  %v585_v33 = vld [vmem:[%s5204_s1 + $0x50] sm:$0xff]  ;;  %s5268_s22 = smov (!%p554_p5, %s4529_s22), 1 }
  0x8f   : > { %v582_v30 = vld [vmem:[%s5204_s1 + $0x38] sm:$0xff]  ;;  %v4834_v34 = vpack.c.bf16 %v4816_v29, %v4813_v28  ;;  %v584_v35 = vld [vmem:[%s5204_s1 + $0x48] sm:$0xff]  ;;  %v587_v37 = vld [vmem:[%s5204_s1 + $0x60] sm:$0xff]  ;;  %s3653_s23 = sshll.u32 %s5268_s22, 4 }
  0x90   : > { %v586_v36 = vld [vmem:[%s5204_s1 + $0x58] sm:$0xff]  ;;  %v589_v38 = vld [vmem:[%s5204_s1 + $0x70] sm:$0xff]  ;;  %v588_v39 = vld [vmem:[%s5204_s1 + $0x68] sm:$0xff] }
  0x91   : > { %3787 = vmatmul.mubr.msk.f32.vlgmr.msra.gmra.mrb[0].mxu0 %vm591_vm0, %v576_v17  ;;  %v590_v40 = vld [vmem:[%s5204_s1 + $0x78] sm:$0xff]  ;;  %v1288_v41 = vld [vmem:[#allocation4] sm:$0xff]  ;;  %v1290_v42 = vld [vmem:[#allocation4 + $0x10] sm:$0xff] }
  0x92   : > { %4023 = vmatpush3.bf16.xpose.msk.msra.mxu0 %vm4715_vm1, %v4739_v11  ;;  %3800 = vmatprep.mubr.msk.f32.mxu0 %vm591_vm0, %v579_v21  ;;  %v1289_v43 = vld [vmem:[#allocation4 + $0x8] sm:$0xff]  ;;  %v1291_v44 = vld [vmem:[#allocation4 + $0x18] sm:$0xff]  ;;  %v1292_v45 = vld [vmem:[#allocation4 + $0x20] sm:$0xff] }
  0x93   : > { %3794 = vmatmul.mubr.msk.f32.vlgmr.msra.gmra.mrb[0].mxu1 %vm591_vm0, %v578_v20  ;;  %4032 = vmatprep.subr.msk.bf16.mxu0 %vm4715_vm1, %v4779_v22  ;;  %v1294_v46 = vld [vmem:[#allocation4 + $0x30] sm:$0xff]  ;;  %v1293_v47 = vld [vmem:[#allocation4 + $0x28] sm:$0xff]  ;;  %v1295_v48 = vld [vmem:[#allocation4 + $0x38] sm:$0xff] }
  0x94   : > { %4029 = vmatpush3.bf16.xpose.msk.msra.mxu1 %vm4715_vm1, %v4750_v14  ;;  %3807 = vmatprep.mubr.msk.f32.mxu1 %vm591_vm0, %v581_v23  ;;  %v1296_v49 = vld [vmem:[#allocation4 + $0x40] sm:$0xff]  ;;  %v1298_v50 = vld [vmem:[#allocation4 + $0x50] sm:$0xff]  ;;  %v1297_v51 = vld [vmem:[#allocation4 + $0x48] sm:$0xff] }
  0x95   : > { %4038 = vmatprep.subr.msk.bf16.mxu1 %vm4715_vm1, %v4786_v24  ;;  %v1299_v52 = vld [vmem:[#allocation4 + $0x58] sm:$0xff]  ;;  %v1300_v53 = vld [vmem:[#allocation4 + $0x60] sm:$0xff]  ;;  %v1302_v54 = vld [vmem:[#allocation4 + $0x70] sm:$0xff] }
  0x96   : > { %v1301_v55 = vld [vmem:[#allocation4 + $0x68] sm:$0xff]  ;;  %v1303_v56 = vld [vmem:[#allocation4 + $0x78] sm:$0xff]  ;;  %v1952_v57 = vld [vmem:[#allocation6] sm:$0xff] }
  0x97   : > { %v2113_v58 = vld [vmem:[#allocation7] sm:$0xff] }
  0x98   : > { %v3236_v59 = vld [vmem:[%s5208_s5] sm:$0xff] }
  0x99   : > { %3801 = vmatmul.mubr.msk.f32.vlgmr.msra.gmra.mrb[2].mxu0 %vm591_vm0, %v580_v27  ;;  %3239 = vperm.xlu1 %4237, %v3236_v59   ;;  %v1961_v59 = vld [vmem:[#allocation6 + $0x48] sm:$0xff] }
  0x9a   : > { %4035 = vmatpush3.bf16.xpose.msk.msra.mxu0 %vm4715_vm1, %v4779_v22  ;;  %3814 = vmatprep.mubr.msk.f32.mxu0 %vm591_vm0, %v583_v31 }
  0x9b   : > { %3808 = vmatmul.mubr.msk.f32.vlgmr.msra.gmra.mrb[2].mxu1 %vm591_vm0, %v582_v30  ;;  %4044 = vmatprep.subr.msk.bf16.mxu0 %vm4715_vm1, %v4826_v32 }
  0x9c   : > { %4041 = vmatpush3.bf16.xpose.msk.msra.mxu1 %vm4715_vm1, %v4786_v24  ;;  %3821 = vmatprep.mubr.msk.f32.mxu1 %vm591_vm0, %v585_v33 }
  0x9d   : > { %4050 = vmatprep.subr.msk.bf16.mxu1 %vm4715_vm1, %v4834_v34 }
  0xa1   : > { %3815 = vmatmul.mubr.msk.f32.vlgmr.msra.gmra.mrb[4].mxu0 %vm591_vm0, %v584_v35 }
  0xa2   : > { %4047 = vmatpush3.bf16.xpose.msk.msra.mxu0 %vm4715_vm1, %v4826_v32  ;;  %3828 = vmatprep.mubr.msk.f32.mxu0 %vm591_vm0, %v587_v37  ;;  %v1954_v37 = vld [vmem:[#allocation6 + $0x10] sm:$0xff] }
  0xa3   : > { %3822 = vmatmul.mubr.msk.f32.vlgmr.msra.gmra.mrb[4].mxu1 %vm591_vm0, %v586_v36  ;;  %4055 = vmatprep.subr.bf16.mxu0 %v4722_v4 }
  0xa4   : > { %4053 = vmatpush3.bf16.xpose.msk.msra.mxu1 %vm4715_vm1, %v4834_v34  ;;  %3835 = vmatprep.mubr.msk.f32.mxu1 %vm591_vm0, %v589_v38 }
  0xa5   : > { %4059 = vmatprep.subr.bf16.mxu1 %v4728_v7 }
  0xa9   : > { %3829 = vmatmul.mubr.msk.f32.vlgmr.msra.gmra.mrb[6].mxu0 %vm591_vm0, %v588_v39 }
  0xaa   : > { %4057 = vmatpush3.bf16.msra.mxu0 %v4722_v4  ;;  %3842 = vmatprep.mubr.msk.f32.mxu0 %vm591_vm0, %v1288_v41 }
  0xab   : > { %3836 = vmatmul.mubr.msk.f32.vlgmr.msra.gmra.mrb[6].mxu1 %vm591_vm0, %v590_v40  ;;  %4063 = vmatprep.subr.bf16.mxu0 %v4739_v11 }
  0xac   : > { %4061 = vmatpush3.bf16.msra.mxu1 %v4728_v7  ;;  %3849 = vmatprep.mubr.msk.f32.mxu1 %vm591_vm0, %v1290_v42  ;;  %v1955_v42 = vld [vmem:[#allocation6 + $0x18] sm:$0xff] }
  0xad   : > { %3843 = vmatmul.mubr.msk.f32.vlgmr.msra.gmra.mrb[8].mxu0 %vm591_vm0, %v1289_v43  ;;  %4067 = vmatprep.subr.bf16.mxu1 %v4750_v14 }
  0xae   : > { %4065 = vmatpush3.bf16.msra.mxu0 %v4739_v11  ;;  %3856 = vmatprep.mubr.msk.f32.mxu0 %vm591_vm0, %v1292_v45  ;;  %v1956_v45 = vld [vmem:[#allocation6 + $0x20] sm:$0xff] }
  0xaf   : > { %3850 = vmatmul.mubr.msk.f32.vlgmr.msra.gmra.mrb[8].mxu1 %vm591_vm0, %v1291_v44  ;;  %4071 = vmatprep.subr.bf16.mxu0 %v4779_v22 }
  0xb0   : > { %4069 = vmatpush3.bf16.msra.mxu1 %v4750_v14  ;;  %3863 = vmatprep.mubr.msk.f32.mxu1 %vm591_vm0, %v1294_v46 }
  0xb1   : > { %3857 = vmatmul.mubr.msk.f32.vlgmr.msra.gmra.mrb[10].mxu0 %vm591_vm0, %v1293_v47  ;;  %4075 = vmatprep.subr.bf16.mxu1 %v4786_v24 }
  0xb2   : > { %4073 = vmatpush3.bf16.msra.mxu0 %v4779_v22  ;;  %3870 = vmatprep.mubr.msk.f32.mxu0 %vm591_vm0, %v1296_v49 }
  0xb3   : > { %3864 = vmatmul.mubr.msk.f32.vlgmr.msra.gmra.mrb[10].mxu1 %vm591_vm0, %v1295_v48  ;;  %4079 = vmatprep.subr.bf16.mxu0 %v4826_v32 }
  0xb4   : > { %4077 = vmatpush3.bf16.msra.mxu1 %v4786_v24  ;;  %3877 = vmatprep.mubr.msk.f32.mxu1 %vm591_vm0, %v1298_v50  ;;  %v1957_v50 = vld [vmem:[#allocation6 + $0x28] sm:$0xff] }
  0xb5   : > { %3871 = vmatmul.mubr.msk.f32.vlgmr.msra.gmra.mrb[12].mxu0 %vm591_vm0, %v1297_v51  ;;  %4083 = vmatprep.subr.bf16.mxu1 %v4834_v34 }
  0xb6   : > { %4081 = vmatpush3.bf16.msra.mxu0 %v4826_v32  ;;  %3884 = vmatprep.mubr.msk.f32.mxu0 %vm591_vm0, %v1300_v53  ;;  %v1958_v53 = vld [vmem:[#allocation6 + $0x30] sm:$0xff] }
  0xb7   : > { %3878 = vmatmul.mubr.msk.f32.vlgmr.msra.gmra.mrb[12].mxu1 %vm591_vm0, %v1299_v52 }
  0xb8   : > { %4085 = vmatpush3.bf16.msra.mxu1 %v4834_v34  ;;  %3891 = vmatprep.mubr.msk.f32.mxu1 %vm591_vm0, %v1302_v54  ;;  %v1953_v34 = vld [vmem:[#allocation6 + $0x8] sm:$0xff] }
  0xb9   : > { %3885 = vmatmul.mubr.msk.f32.vlgmr.msra.gmra.mrb[14].mxu0 %vm591_vm0, %v1301_v55 }
  0xba   : > { %3926 = vmatprep.mubr.f32.mxu0 %v1952_v57  ;;  %v1959_v57 = vld [vmem:[#allocation6 + $0x38] sm:$0xff] }
  0xbb   : > { %3892 = vmatmul.mubr.msk.f32.vlgmr.msra.gmra.mrb[14].mxu1 %vm591_vm0, %v1303_v56 }
  0xbc   : > { %3982 = vmatprep.mubr.f32.mxu1 %v2113_v58  ;;  %v1960_v58 = vld [vmem:[#allocation6 + $0x40] sm:$0xff] }
 0x164   : > { %v3788_v61 = vpop.f32.mrb[0].mxu0 }
 0x165   : > { %v670_v62 = vpop.f32.mrb[1].mxu0 }
 0x166   : > { %v3795_v63 = vpop.f32.mrb[0].mxu1  ;;  %v4086_v0 = vpack.c.bf16 %v3788_v61, %v670_v62  ;;  %v1962_v61 = vld [vmem:[#allocation6 + $0x50] sm:$0xff]  ;;  %v1963_v62 = vld [vmem:[#allocation6 + $0x58] sm:$0xff] }
 0x167   : > { %v757_v1 = vpop.f32.mrb[1].mxu1 }
 0x168   : > { %v4090_v2 = vpack.c.bf16 %v3795_v63, %v757_v1  ;;  %4087 = vmatprep.subr.bf16.mxu0 %v4086_v0  ;;  %v1964_v63 = vld [vmem:[#allocation6 + $0x60] sm:$0xff]  ;;  %v1966_v1 = vld [vmem:[#allocation6 + $0x70] sm:$0xff] }
 0x169   : > { %4089 = vmatpush3.bf16.msra.mxu0 %v4086_v0  ;;  %v1965_v0 = vld [vmem:[#allocation6 + $0x68] sm:$0xff] }
 0x16a   : > { %4091 = vmatprep.subr.bf16.mxu0 %v4090_v2 }
 0x16c   : > { %v3802_v3 = vpop.f32.mrb[2].mxu0 }
 0x16d   : > { %v844_v4 = vpop.f32.mrb[3].mxu0  ;;  %4093 = vmatpush3.bf16.msra.mxu0 %v4090_v2  ;;  %v1967_v2 = vld [vmem:[#allocation6 + $0x78] sm:$0xff] }
 0x16e   : > { %v3809_v5 = vpop.f32.mrb[2].mxu1  ;;  %v4094_v6 = vpack.c.bf16 %v3802_v3, %v844_v4  ;;  %v2114_v3 = vld [vmem:[#allocation7 + $0x8] sm:$0xff]  ;;  %v2115_v4 = vld [vmem:[#allocation7 + $0x10] sm:$0xff] }
 0x16f   : > { %v931_v7 = vpop.f32.mrb[3].mxu1 }
 0x170   : > { %v4098_v8 = vpack.c.bf16 %v3809_v5, %v931_v7  ;;  %4095 = vmatprep.subr.bf16.mxu0 %v4094_v6  ;;  %v2116_v5 = vld [vmem:[#allocation7 + $0x18] sm:$0xff]  ;;  %v2118_v7 = vld [vmem:[#allocation7 + $0x28] sm:$0xff] }
 0x171   : > { %4097 = vmatpush3.bf16.msra.mxu0 %v4094_v6  ;;  %v2117_v6 = vld [vmem:[#allocation7 + $0x20] sm:$0xff] }
 0x172   : > { %4099 = vmatprep.subr.bf16.mxu0 %v4098_v8 }
 0x174   : > { %v3816_v9 = vpop.f32.mrb[4].mxu0 }
 0x175   : > { %v1018_v10 = vpop.f32.mrb[5].mxu0  ;;  %4101 = vmatpush3.bf16.msra.mxu0 %v4098_v8  ;;  %v2119_v8 = vld [vmem:[#allocation7 + $0x30] sm:$0xff] }
 0x176   : > { %v3823_v11 = vpop.f32.mrb[4].mxu1  ;;  %v4102_v12 = vpack.c.bf16 %v3816_v9, %v1018_v10  ;;  %v2120_v9 = vld [vmem:[#allocation7 + $0x38] sm:$0xff]  ;;  %v2121_v10 = vld [vmem:[#allocation7 + $0x40] sm:$0xff] }
 0x177   : > { %v1105_v13 = vpop.f32.mrb[5].mxu1 }
 0x178   : > { %v4106_v14 = vpack.c.bf16 %v3823_v11, %v1105_v13  ;;  %4103 = vmatprep.subr.bf16.mxu0 %v4102_v12  ;;  %v2122_v11 = vld [vmem:[#allocation7 + $0x48] sm:$0xff]  ;;  %v2124_v13 = vld [vmem:[#allocation7 + $0x58] sm:$0xff] }
 0x179   : > { %4105 = vmatpush3.bf16.msra.mxu0 %v4102_v12  ;;  %v2123_v12 = vld [vmem:[#allocation7 + $0x50] sm:$0xff] }
 0x17a   : > { %4107 = vmatprep.subr.bf16.mxu0 %v4106_v14 }
 0x17c   : > { %v3830_v16 = vpop.f32.mrb[6].mxu0 }
 0x17d   : > { %v1192_v17 = vpop.f32.mrb[7].mxu0  ;;  %4109 = vmatpush3.bf16.msra.mxu0 %v4106_v14  ;;  %v2125_v14 = vld [vmem:[#allocation7 + $0x60] sm:$0xff] }
 0x17e   : > { %v3837_v19 = vpop.f32.mrb[6].mxu1  ;;  %v4110_v20 = vpack.c.bf16 %v3830_v16, %v1192_v17  ;;  %v2126_v16 = vld [vmem:[#allocation7 + $0x68] sm:$0xff]  ;;  %v2127_v17 = vld [vmem:[#allocation7 + $0x70] sm:$0xff] }
 0x17f   : > { %v1279_v21 = vpop.f32.mrb[7].mxu1 }
 0x180   : > { %v4114_v22 = vpack.c.bf16 %v3837_v19, %v1279_v21  ;;  %4111 = vmatprep.subr.bf16.mxu0 %v4110_v20  ;;  %v3844_v23 = vpop.f32.mrb[8].mxu0  ;;  %v2128_v19 = vld [vmem:[#allocation7 + $0x78] sm:$0xff] }
 0x181   : > { %4113 = vmatpush3.bf16.msra.mxu0 %v4110_v20  ;;  %v1376_v24 = vpop.f32.mrb[9].mxu0 }
 0x182   : > { %v3851_v27 = vpop.f32.mrb[8].mxu1  ;;  %4115 = vmatprep.subr.bf16.mxu0 %v4114_v22  ;;  %v4118_v30 = vpack.c.bf16 %v3844_v23, %v1376_v24 }
 0x183   : > { %v1457_v31 = vpop.f32.mrb[9].mxu1 }
 0x184   : > { %v4122_v32 = vpack.c.bf16 %v3851_v27, %v1457_v31  ;;  %4119 = vmatprep.subr.bf16.mxu1 %v4118_v30  ;;  %v3858_v33 = vpop.f32.mrb[10].mxu0 }
 0x185   : > { %4117 = vmatpush3.bf16.msra.mxu0 %v4114_v22  ;;  %4121 = vmatpush3.bf16.msra.mxu1 %v4118_v30  ;;  %v1538_v35 = vpop.f32.mrb[11].mxu0 }
 0x186   : > { %v3865_v36 = vpop.f32.mrb[10].mxu1  ;;  %4123 = vmatprep.subr.bf16.mxu1 %v4122_v32  ;;  %v4126_v38 = vpack.c.bf16 %v3858_v33, %v1538_v35 }
 0x187   : > { %v1619_v39 = vpop.f32.mrb[11].mxu1 }
 0x188   : > { %v4130_v40 = vpack.c.bf16 %v3865_v36, %v1619_v39  ;;  %3927 = vmatmul.mubr.f32.vlgmr.msra.gmra.mrb[16].mxu0 %v1953_v34  ;;  %v3872_v41 = vpop.f32.mrb[12].mxu0 }
 0x189   : > { %3929 = vmatprep.mubr.f32.mxu0 %v1954_v37  ;;  %4125 = vmatpush3.bf16.msra.mxu1 %v4122_v32  ;;  %v1700_v43 = vpop.f32.mrb[13].mxu0 }
 0x18a   : > { %v3879_v44 = vpop.f32.mrb[12].mxu1  ;;  %4127 = vmatprep.subr.bf16.mxu1 %v4126_v38  ;;  %v4134_v46 = vpack.c.bf16 %v3872_v41, %v1700_v43 }
 0x18b   : > { %v1781_v47 = vpop.f32.mrb[13].mxu1 }
 0x18c   : > { %v4138_v48 = vpack.c.bf16 %v3879_v44, %v1781_v47  ;;  %3930 = vmatmul.mubr.f32.gmra.mrb[18].mxu0 %v1955_v42  ;;  %v3886_v49 = vpop.f32.mrb[14].mxu0 }
 0x18d   : > { %3932 = vmatprep.mubr.f32.mxu0 %v1956_v45  ;;  %4129 = vmatpush3.bf16.msra.mxu1 %v4126_v38  ;;  %v1862_v51 = vpop.f32.mrb[15].mxu0 }
 0x18e   : > { %v3893_v52 = vpop.f32.mrb[14].mxu1  ;;  %4131 = vmatprep.subr.bf16.mxu1 %v4130_v40  ;;  %v4142_v54 = vpack.c.bf16 %v3886_v49, %v1862_v51 }
 0x18f   : > { %v1943_v55 = vpop.f32.mrb[15].mxu1 }
 0x190   : > { %v4146_v56 = vpack.c.bf16 %v3893_v52, %v1943_v55  ;;  %3933 = vmatmul.mubr.f32.gmra.mrb[20].mxu0 %v1957_v50 }
 0x191   : > { %3935 = vmatprep.mubr.f32.mxu0 %v1958_v53  ;;  %4133 = vmatpush3.bf16.msra.mxu1 %v4130_v40 }
 0x192   : > { %4135 = vmatprep.subr.bf16.mxu1 %v4134_v46 }
 0x194   : > { %3936 = vmatmul.mubr.f32.gmra.mrb[22].mxu0 %v1959_v57  ;;  %v4935_v57 = vpop.permute.xlu1 %3239 }
 0x195   : > { %3938 = vmatprep.mubr.f32.mxu0 %v1960_v58  ;;  %4137 = vmatpush3.bf16.msra.mxu1 %v4134_v46 }
 0x196   : > { %4139 = vmatprep.subr.bf16.mxu1 %v4138_v48 }
 0x198   : > { %3939 = vmatmul.mubr.f32.gmra.mrb[24].mxu0 %v1961_v59 }
 0x199   : > { %3941 = vmatprep.mubr.f32.mxu0 %v1962_v61  ;;  %4141 = vmatpush3.bf16.msra.mxu1 %v4138_v48 }
 0x19a   : > { %4143 = vmatprep.subr.bf16.mxu1 %v4142_v54 }
 0x19c   : > { %3942 = vmatmul.mubr.f32.gmra.mrb[26].mxu0 %v1963_v62  ;;  %v4420_v62 = vmov 1983009808  }
 0x19d   : > { %3944 = vmatprep.mubr.f32.mxu0 %v1964_v63  ;;  %4145 = vmatpush3.bf16.msra.mxu1 %v4142_v54  ;;  %v2549_v63 = vunpack.c.l.s4 %v4420_v62 }
 0x19e   : > { %4147 = vmatprep.subr.bf16.mxu1 %v4146_v56 }
 0x1a0   : > { %3945 = vmatmul.mubr.f32.gmra.mrb[28].mxu0 %v1965_v0  ;;  %v2551_v0 = vlaneseq }
 0x1a1   : > { %3947 = vmatprep.mubr.f32.mxu0 %v1966_v1  ;;  %4149 = vmatpush3.bf16.msra.mxu1 %v4146_v56  ;;  %v3244_v56 = vld [vmem:[%s5209_s6] sm:$0xff] }
 0x1a4   : > { %3948 = vmatmul.mubr.f32.gmra.mrb[30].mxu0 %v1967_v2  ;;  %3983 = vmatmul.mubr.f32.vlgmr.msra.gmra.mrb[16].mxu1 %v2114_v3  ;;  %v2550_v2 = vunpack.c.0.s8 %v2549_v63  ;;  %v2552_v3 = vshrl.u32 %v2551_v0, 7 }
 0x1a5   : > { %3985 = vmatprep.mubr.f32.mxu1 %v2115_v4 }
 0x1a8   : > { %3986 = vmatmul.mubr.f32.gmra.mrb[18].mxu1 %v2116_v5 }
 0x1a9   : > { %3988 = vmatprep.mubr.f32.mxu1 %v2117_v6 }
 0x1ac   : > { %3989 = vmatmul.mubr.f32.gmra.mrb[20].mxu1 %v2118_v7 }
 0x1ad   : > { %3991 = vmatprep.mubr.f32.mxu1 %v2119_v8 }
 0x1b0   : > { %3992 = vmatmul.mubr.f32.gmra.mrb[22].mxu1 %v2120_v9  ;;  %v4937_v9 = vsub.s32 %v2550_v2, %v2552_v3 }
 0x1b1   : > { %3994 = vmatprep.mubr.f32.mxu1 %v2121_v10 }
 0x1b4   : > { %3995 = vmatmul.mubr.f32.gmra.mrb[24].mxu1 %v2122_v11 }
 0x1b5   : > { %3997 = vmatprep.mubr.f32.mxu1 %v2123_v12 }
 0x1b8   : > { %3998 = vmatmul.mubr.f32.gmra.mrb[26].mxu1 %v2124_v13 }
 0x1b9   : > { %4000 = vmatprep.mubr.f32.mxu1 %v2125_v14 }
 0x1bc   : > { %4001 = vmatmul.mubr.f32.gmra.mrb[28].mxu1 %v2126_v16 }
 0x1bd   : > { %4003 = vmatprep.mubr.f32.mxu1 %v2127_v17 }
 0x1c0   : > { %4004 = vmatmul.mubr.f32.gmra.mrb[30].mxu1 %v2128_v19 }
 0x25b   : > { %v3928_v20 = vpop.f32.mrb[16].mxu0 }
 0x25c   : > { %v2034_v21 = vpop.f32.mrb[17].mxu0 }
 0x25d   : > { %2274 = vxpose.xlu0.b32.start [1/2] (short) (narrow) %v2034_v21, 16 }
 0x25f   : > { %v3931_v22 = vpop.f32.mrb[18].mxu0 }
 0x260   : > { %v2044_v23 = vpop.f32.mrb[19].mxu0 }
 0x261   : > { %2275 = vxpose.xlu0.b32.end [2/2] (short) (narrow) %v3928_v20, 16  ;;  %2306 = vxpose.xlu1.b32.start [1/2] (short) (narrow) %v2044_v23, 16 }
 0x263   : > { %v3934_v24 = vpop.f32.mrb[20].mxu0 }
 0x264   : > { %v2054_v27 = vpop.f32.mrb[21].mxu0 }
 0x265   : > { %2307 = vxpose.xlu1.b32.end [2/2] (short) (narrow) %v3931_v22, 16  ;;  %2338 = vxpose.xlu0.b32.start [1/2] (short) (narrow) %v2054_v27, 16 }
 0x267   : > { %v3937_v30 = vpop.f32.mrb[22].mxu0 }
 0x268   : > { %v2064_v31 = vpop.f32.mrb[23].mxu0 }
 0x269   : > { %2339 = vxpose.xlu0.b32.end [2/2] (short) (narrow) %v3934_v24, 16  ;;  %2370 = vxpose.xlu1.b32.start [1/2] (short) (narrow) %v2064_v31, 16 }
 0x26b   : > { %v3940_v32 = vpop.f32.mrb[24].mxu0 }
 0x26c   : > { %v2074_v33 = vpop.f32.mrb[25].mxu0 }
 0x26d   : > { %2371 = vxpose.xlu1.b32.end [2/2] (short) (narrow) %v3937_v30, 16  ;;  %2402 = vxpose.xlu0.b32.start [1/2] (short) (narrow) %v2074_v33, 16  ;;  %v4421_v33 = vmov 1934713408  }
 0x26f   : > { %v3943_v34 = vpop.f32.mrb[26].mxu0 }
 0x270   : > { %v2084_v35 = vpop.f32.mrb[27].mxu0 }
 0x271   : > { %2403 = vxpose.xlu0.b32.end [2/2] (short) (narrow) %v3940_v32, 16  ;;  %2434 = vxpose.xlu1.b32.start [1/2] (short) (narrow) %v2084_v35, 16 }
 0x273   : > { %v3946_v36 = vpop.f32.mrb[28].mxu0 }
 0x274   : > { %v2094_v37 = vpop.f32.mrb[29].mxu0 }
 0x275   : > { %2435 = vxpose.xlu1.b32.end [2/2] (short) (narrow) %v3943_v34, 16  ;;  %2466 = vxpose.xlu0.b32.start [1/2] (short) (narrow) %v2094_v37, 16  ;;  %v2613_v34 = vunpack.c.l.s4 %v4421_v33 }
 0x277   : > { %v3949_v38 = vpop.f32.mrb[30].mxu0  ;;  %v3984_v39 = vpop.f32.mrb[16].mxu1 }
 0x278   : > { %v2104_v40 = vpop.f32.mrb[31].mxu0  ;;  %v2195_v41 = vpop.f32.mrb[17].mxu1 }
 0x279   : > { %2467 = vxpose.xlu0.b32.end [2/2] (short) (narrow) %v3946_v36, 16  ;;  %2498 = vxpose.xlu1.b32.start [1/2] (short) (narrow) %v2104_v40, 16 }
 0x27b   : > { %v3987_v42 = vpop.f32.mrb[18].mxu1 }
 0x27c   : > { %v2205_v43 = vpop.f32.mrb[19].mxu1 }
 0x27d   : > { %2499 = vxpose.xlu1.b32.end [2/2] (short) (narrow) %v3949_v38, 16 }
 0x27f   : > { %v3990_v44 = vpop.f32.mrb[20].mxu1 }
 0x280   : > { %v2215_v45 = vpop.f32.mrb[21].mxu1 }
 0x283   : > { %v3993_v46 = vpop.f32.mrb[22].mxu1 }
 0x284   : > { %v2225_v47 = vpop.f32.mrb[23].mxu1 }
 0x287   : > { %v4917_v48 = vpop.f32.mrb[24].mxu1 }
 0x288   : > { %v4919_v49 = vpop.f32.mrb[25].mxu1 }
 0x28b   : > { %v4921_v50 = vpop.f32.mrb[26].mxu1 }
 0x28c   : > { %v4923_v51 = vpop.f32.mrb[27].mxu1 }
 0x28f   : > { %v4925_v52 = vpop.f32.mrb[28].mxu1 }
 0x290   : > { %v2255_v53 = vpop.f32.mrb[29].mxu1 }
 0x293   : > { %v4927_v54 = vpop.f32.mrb[30].mxu1 }
 0x294   : > { %v4929_v55 = vpop.f32.mrb[31].mxu1 }
 0x29b   : > { %3247 = vperm.xlu1 %4237, %v3244_v56  }
 0x2a2   : > { %4238 = vset.pattern.permute.xlu0 %v4419_v60 }
 0x2dd   : > { %v2290_v58 = vpop.trf.xlu0 }
 0x2de   : > { %v2530_v5 = vadd.f32 %v2290_v58, %v2195_v41 }
 0x2e1   : > { %v2291_v59 = vpop.trf.xlu0  ;;  %v2322_v61 = vpop.trf.xlu1 }
 0x2e2   : > { %v2531_v11 = vadd.f32 %v3984_v39, %v2291_v59  ;;  %v2532_v12 = vadd.f32 %v2322_v61, %v2205_v43 }
 0x2e5   : > { %v2323_v1 = vpop.trf.xlu1  ;;  %v2354_v4 = vpop.trf.xlu0 }
 0x2e6   : > { %v2534_v6 = vadd.f32 %v2354_v4, %v2215_v45  ;;  %v2533_v31 = vadd.f32 %v3987_v42, %v2323_v1 }
 0x2e8   : > { %v2546_v7 = vcombine.low %v2530_v5, %v2534_v6  ;;  %v2547_v8 = vcombine.high %v2530_v5, %v2534_v6 }
 0x2e9   : > { %v2355_v10 = vpop.trf.xlu0  ;;  %v2386_v60 = vpop.trf.xlu1 }
 0x2ea   : > { %v2535_v13 = vadd.f32 %v3990_v44, %v2355_v10  ;;  %v2536_v14 = vadd.f32 %v2386_v60, %v2225_v47  ;;  %v2554_v23 = vrot.slane %v2546_v7, %v4937_v9  ;;  %v2561_v24 = vrot.slane %v2547_v8, %v4937_v9 }
 0x2ec   : > { %v2682_v16 = vcombine.low %v2531_v11, %v2535_v13  ;;  %v2683_v17 = vcombine.high %v2531_v11, %v2535_v13  ;;  %v2562_v19 = vcombine.low %v2532_v12, %v2536_v14  ;;  %v2563_v20 = vcombine.high %v2532_v12, %v2536_v14 }
 0x2ed   : > { %v2387_v21 = vpop.trf.xlu1  ;;  %v2418_v22 = vpop.trf.xlu0 }
 0x2ee   : > { %v2570_v27 = vrot.slane %v2562_v19, %v4937_v9  ;;  %v2577_v30 = vrot.slane %v2563_v20, %v4937_v9  ;;  %v2537_v32 = vadd.f32 %v3993_v46, %v2387_v21  ;;  %v2690_v44 = vrot.slane %v2682_v16, %v4937_v9 }
 0x2ef   : > { %v4945_v45 = vrot.slane %v2683_v17, %v4937_v9  ;;  %v2614_v46 = vunpack.c.0.s8 %v2613_v34  ;;  %v2538_v0 = vadd.f32 %v2418_v22, %v4919_v49 }
 0x2f0   : > { %v2610_v35 = vcombine.low %v2554_v23, %v2570_v27  ;;  %v2611_v36 = vcombine.high %v2554_v23, %v2570_v27  ;;  %v2626_v37 = vcombine.low %v2561_v24, %v2577_v30  ;;  %v2627_v38 = vcombine.high %v2561_v24, %v2577_v30 }
 0x2f1   : > { %v2698_v39 = vcombine.low %v2533_v31, %v2537_v32  ;;  %v2699_v40 = vcombine.high %v2533_v31, %v2537_v32  ;;  %v2419_v41 = vpop.trf.xlu0  ;;  %v2450_v43 = vpop.trf.xlu1  ;;  %v4956_v7 = vsub.s32 %v2614_v46, %v2552_v3 }
 0x2f2   : > { %v2539_v8 = vadd.f32 %v4917_v48, %v2419_v41  ;;  %v2540_v10 = vadd.f32 %v2450_v43, %v4923_v51 }
 0x2f3   : > { %v2706_v47 = vrot.slane %v2698_v39, %v4937_v9  ;;  %v4949_v42 = vrot.slane %v2699_v40, %v4937_v9  ;;  %v4964_v17 = vrot.slane %v2610_v35, %v4956_v7  ;;  %v2634_v3 = vrot.slane %v2626_v37, %v4956_v7 }
 0x2f4   : > { %v4975_v22 = vrot.slane %v2627_v38, %v4956_v7 }
 0x2f5   : > { %v2746_v56 = vcombine.low %v2690_v44, %v2706_v47  ;;  %v2747_v58 = vcombine.high %v2690_v44, %v2706_v47  ;;  %v2762_v59 = vcombine.low %v4945_v45, %v4949_v42  ;;  %v2763_v61 = vcombine.high %v4945_v45, %v4949_v42  ;;  %v2451_v62 = vpop.trf.xlu1  ;;  %v2482_v63 = vpop.trf.xlu0 }
 0x2f6   : > { %v2542_v1 = vadd.f32 %v2482_v63, %v2255_v53  ;;  %v2625_v53 = vrot.slane %v2611_v36, %v4956_v7  ;;  %v2541_v19 = vadd.f32 %v4921_v50, %v2451_v62  ;;  %v4427_v42 = vmov 0.0  }
 0x2f7   : > { %v2761_v21 = vrot.slane %v2747_v58, %v4956_v7  ;;  %v2770_v33 = vrot.slane %v2762_v59, %v4956_v7  ;;  %v4979_v34 = vrot.slane %v2746_v56, %v4956_v7  ;;  %3337 = vmatprep.mubr.f32.mxu0 %v4427_v42  ;;  %3460 = vmatprep.mubr.f32.mxu1 %v4427_v42 }
 0x2f8   : > { %v2578_v2 = vcombine.low %v2538_v0, %v2542_v1  ;;  %v2579_v4 = vcombine.high %v2538_v0, %v2542_v1 }
 0x2f9   : > { %v2483_v5 = vpop.trf.xlu0  ;;  %v2514_v6 = vpop.trf.xlu1 }
 0x2fa   : > { %v2543_v60 = vadd.f32 %v4925_v52, %v2483_v5  ;;  %v2544_v11 = vadd.f32 %v2514_v6, %v4929_v55  ;;  %v2586_v48 = vrot.slane %v2578_v2, %v4937_v9  ;;  %v2593_v51 = vrot.slane %v2579_v4, %v4937_v9 }
 0x2fb   : > { %v2777_v6 = vrot.slane %v2763_v61, %v4956_v7  ;;  %v3254_v61 = vld [vmem:[%s5211_s8] sm:$0xff] }
 0x2fc   : > { %v2714_v12 = vcombine.low %v2539_v8, %v2543_v60  ;;  %v2715_v13 = vcombine.high %v2539_v8, %v2543_v60  ;;  %v2594_v14 = vcombine.low %v2540_v10, %v2544_v11  ;;  %v2595_v16 = vcombine.high %v2540_v10, %v2544_v11 }
 0x2fd   : > { %v2515_v49 = vpop.trf.xlu1 }
 0x2fe   : > { %v2602_v52 = vrot.slane %v2594_v14, %v4937_v9  ;;  %v2609_v55 = vrot.slane %v2595_v16, %v4937_v9  ;;  %v2545_v20 = vadd.f32 %v4927_v54, %v2515_v49  ;;  %v2722_v37 = vrot.slane %v2714_v12, %v4937_v9  ;;  %v3350_v49 = vld [vmem:[%s5212_s9] sm:$0xff] }
 0x2ff   : > { %v2729_v38 = vrot.slane %v2715_v13, %v4937_v9 }
 0x300   : > { %v2642_v23 = vcombine.low %v2586_v48, %v2602_v52  ;;  %v2643_v24 = vcombine.high %v2586_v48, %v2602_v52  ;;  %v2658_v27 = vcombine.low %v2593_v51, %v2609_v55  ;;  %v2659_v30 = vcombine.high %v2593_v51, %v2609_v55  ;;  %v3255_v48 = vld [vmem:[%s5211_s8 + $0x8] sm:$0xff]  ;;  %v3366_v51 = vld [vmem:[%s5252_s17] sm:$0xff] }
 0x301   : > { %v2730_v31 = vcombine.low %v2541_v19, %v2545_v20  ;;  %v2731_v32 = vcombine.high %v2541_v19, %v2545_v20  ;;  %v3387_v52 = vld [vmem:[%s5254_s24] sm:$0xff] }
 0x302   : > { %v2657_v50 = vrot.slane %v2643_v24, %v4956_v7  ;;  %v4983_v54 = vrot.slane %v2642_v23, %v4956_v7  ;;  %v2666_v35 = vrot.slane %v2658_v27, %v4956_v7  ;;  %v2673_v36 = vrot.slane %v2659_v30, %v4956_v7 }
 0x303   : > { %v2738_v39 = vrot.slane %v2730_v31, %v4937_v9  ;;  %v2745_v40 = vrot.slane %v2731_v32, %v4937_v9 }
 0x304   : > { %v2677_v41 = vcombine.high %v2625_v53, %v2657_v50  ;;  %v2675_v43 = vcombine.high %v4964_v17, %v4983_v54  ;;  %v2678_v44 = vcombine.low %v2634_v3, %v2666_v35  ;;  %v2676_v47 = vcombine.low %v2625_v53, %v2657_v50  ;;  %v3351_v53 = vld [vmem:[%s5212_s9 + $0x8] sm:$0xff] }
 0x305   : > { %v2778_v46 = vcombine.low %v2722_v37, %v2738_v39  ;;  %v2779_v56 = vcombine.high %v2722_v37, %v2738_v39  ;;  %v2794_v58 = vcombine.low %v2729_v38, %v2745_v40  ;;  %v2795_v59 = vcombine.high %v2729_v38, %v2745_v40 }
 0x306   : > { %2827 = vrot.lane.b32.xlu0 %v2677_v41, %s4422_s11  ;;  %2819 = vrot.lane.b32.xlu1 %v2675_v43, %s4423_s26  ;;  %v2679_v62 = vcombine.high %v2634_v3, %v2666_v35  ;;  %v2680_v63 = vcombine.low %v4975_v22, %v2673_v36  ;;  %v2681_v0 = vcombine.high %v4975_v22, %v2673_v36  ;;  %v3467_v3 = vld [vmem:[%s5253_s16] sm:$0xff] }
 0x307   : > { %v2793_v1 = vrot.slane %v2779_v56, %v4956_v7  ;;  %v2802_v2 = vrot.slane %v2794_v58, %v4956_v7  ;;  %v5000_v4 = vrot.slane %v2778_v46, %v4956_v7  ;;  %v2809_v5 = vrot.slane %v2795_v59, %v4956_v7 }
 0x308   : > { %v2674_v8 = vcombine.low %v4964_v17, %v4983_v54  ;;  %v3367_v17 = vld [vmem:[%s5252_s17 + $0x8] sm:$0xff] }
 0x309   : > { %v2812_v10 = vcombine.low %v2761_v21, %v2793_v1  ;;  %v2814_v60 = vcombine.low %v2770_v33, %v2802_v2  ;;  %v2811_v11 = vcombine.high %v4979_v34, %v5000_v4  ;;  %v2815_v12 = vcombine.high %v2770_v33, %v2802_v2 }
 0x30a   : > { %2831 = vrot.lane.b32.xlu0 %v2678_v44, %s5230_s29  ;;  %2823 = vrot.lane.b32.xlu1 %v2676_v47, %s4425_s21  ;;  %v2813_v13 = vcombine.high %v2761_v21, %v2793_v1  ;;  %v2816_v14 = vcombine.low %v2777_v6, %v2809_v5  ;;  %v2817_v16 = vcombine.high %v2777_v6, %v2809_v5  ;;  %v4239_v5 = vld [vmem:[%s4699_s25] sm:$0xff] }
 0x30b   : > { %v2810_v45 = vcombine.low %v4979_v34, %v5000_v4  ;;  %v4240_v6 = vld [vmem:[%s4699_s25 + $0x20] sm:$0xff] }
 0x30e   : > { %2835 = vrot.lane.b32.xlu0 %v2679_v62, %s5228_s28  ;;  %2851 = vrot.lane.b32.xlu1 %v2812_v10, %s4425_s21  ;;  %v4241_v10 = vld [vmem:[%s4699_s25 + $0x10] sm:$0xff] }
 0x312   : > { %2859 = vrot.lane.b32.xlu1 %v2814_v60, %s5230_s29  ;;  %2847 = vrot.lane.b32.xlu0 %v2811_v11, %s4423_s26  ;;  %v4242_v60 = vld [vmem:[%s4699_s25 + $0x30] sm:$0xff] }
 0x313   : > { %v2910_v11 = vcombine.low %v4241_v10, %v4242_v60 }
 0x316   : > { %2863 = vrot.lane.b32.xlu1 %v2815_v12, %s5228_s28  ;;  %2855 = vrot.lane.b32.xlu0 %v2813_v13, %s4422_s11  ;;  %v2926_v12 = vcombine.low %v4762_v15, %v4804_v25  ;;  %v2942_v13 = vcombine.low %v4769_v18, %v4813_v28 }
 0x318   : > { %v2934_v15 = vrot.slane %v2926_v12, %v4937_v9  ;;  %v2950_v18 = vrot.slane %v2942_v13, %v4937_v9 }
 0x31a   : > { %2867 = vrot.lane.b32.xlu1 %v2816_v14, %s5226_s14  ;;  %2839 = vrot.lane.b32.xlu0 %v2680_v63, %s5226_s14  ;;  %s5255_s14 = sld [smem:[#allocation17_spill]]  ;;  %v3248_v19 = vpop.permute.xlu1 %3247  ;;  %v4243_v14 = vld [vmem:[%s4699_s25 + $0x8] sm:$0xff] }
 0x31e   : > { %2871 = vrot.lane.b32.xlu1 %v2817_v16, %s5224_s30  ;;  %2843 = vrot.lane.b32.xlu0 %v2681_v0, %s5224_s30  ;;  %s5256_s30 = sld [smem:[#allocation12_spill]]  ;;  %v4244_v16 = vld [vmem:[%s4699_s25 + $0x28] sm:$0xff] }
 0x320   : > { %v3475_v55 = vld [vmem:[%s5255_s14] sm:$0xff]  ;;  %s5262_s14 = sld [smem:[#allocation18_spill]] }
 0x322   : > { %3258 = vperm.xlu1 %4237, %v3254_v61   ;;  %3263 = vperm.xlu0 %4238, %v3255_v48   ;;  %v4246_v61 = vld [vmem:[%s4699_s25 + $0x38] sm:$0xff] }
 0x324   : > { %v3252_v4 = vld [vmem:[%s5256_s30] sm:$0xff] }
 0x326   : > { %3354 = vperm.xlu1 %4237, %v3350_v49   ;;  %3370 = vperm.xlu0 %4238, %v3366_v51   ;;  %s558_s29 = scalar_lea.vmem %s5262_s14, %s3653_s23 }
 0x32a   : > { %3359 = vperm.xlu1 %4237, %v3351_v53   ;;  %3390 = vperm.xlu0 %4238, %v3387_v52   ;;  %v4247_v53 = vld [vmem:[%s4699_s25 + $0x48] sm:$0xff]  ;;  %v2918_v52 = vrot.slane %v2910_v11, %v4937_v9 }
 0x32e   : > { %3375 = vperm.xlu1 %4237, %v3367_v17   ;;  %3478 = vperm.xlu0 %4238, %v3475_v55   ;;  %v3062_v17 = vcombine.low %v4247_v53, %v4807_v26 }
 0x330   : > { %v3070_v55 = vrot.slane %v3062_v17, %v4937_v9 }
 0x332   : > { %3470 = vperm.xlu1 %4237, %v3467_v3   ;;  %v4248_v3 = vld [vmem:[%s4699_s25 + $0x58] sm:$0xff] }
 0x333   : > { %v3078_v48 = vcombine.low %v4248_v3, %v4816_v29  ;;  %v2991_v29 = vcombine.high %v2934_v15, %v2950_v18 }
 0x378   : > { %v2828_v20 = vpop.permute.xlu0 %2827  ;;  %v2820_v21 = vpop.permute.xlu1 %2819 }
 0x379   : > { %v2874_v32 = vsel %vm591_vm0, %v2674_v8, %v2820_v21  ;;  %v2894_v8 = vcombine.low %v4239_v5, %v4240_v6 }
 0x37b   : > { %v2902_v51 = vrot.slane %v2894_v8, %v4937_v9 }
 0x37c   : > { %v2832_v22 = vpop.permute.xlu0 %2831  ;;  %v2824_v23 = vpop.permute.xlu1 %2823 }
 0x37d   : > { %v2876_v34 = vsel %vm2875_vm2, %v2874_v32, %v2824_v23  ;;  %v2958_v26 = vcombine.low %v2902_v51, %v2918_v52  ;;  %v2959_v21 = vcombine.high %v2902_v51, %v2918_v52 }
 0x37e   : > { %v2878_v36 = vsel %vm2877_vm3, %v2876_v34, %v2828_v20  ;;  %v2990_v20 = vcombine.low %v2934_v15, %v2950_v18 }
 0x37f   : > { %v2880_v39 = vsel %vm2879_vm4, %v2878_v36, %v2832_v22  ;;  %v2973_v32 = vrot.slane %v2959_v21, %v4956_v7 }
 0x380   : > { %v2836_v24 = vpop.permute.xlu0 %2835  ;;  %v2852_v27 = vpop.permute.xlu1 %2851 }
 0x381   : > { %v2882_v44 = vsel %vm2881_vm5, %v2880_v39, %v2836_v24 }
 0x384   : > { %v2848_v30 = vpop.permute.xlu0 %2847  ;;  %v2860_v31 = vpop.permute.xlu1 %2859 }
 0x385   : > { %v2887_v33 = vsel %vm591_vm0, %v2810_v45, %v2848_v30  ;;  %v3030_v45 = vcombine.low %v4243_v14, %v4244_v16  ;;  %v5102_v30 = vrot.slane %v2958_v26, %v4956_v7 }
 0x386   : > { %v2888_v54 = vsel %vm2875_vm2, %v2887_v33, %v2852_v27  ;;  %v3005_v33 = vrot.slane %v2991_v29, %v4956_v7 }
 0x387   : > { %v3038_v25 = vrot.slane %v3030_v45, %v4937_v9 }
 0x388   : > { %v2856_v50 = vpop.permute.xlu0 %2855  ;;  %v2864_v35 = vpop.permute.xlu1 %2863  ;;  %v3024_v39 = vcombine.low %v2973_v32, %v3005_v33 }
 0x389   : > { %v2889_v37 = vsel %vm2877_vm3, %v2888_v54, %v2856_v50 }
 0x38a   : > { %v2890_v38 = vsel %vm2879_vm4, %v2889_v37, %v2860_v31  ;;  %v5105_v31 = vrot.slane %v2990_v20, %v4956_v7  ;;  %v2895_v37 = vcombine.high %v4239_v5, %v4240_v6 }
 0x38b   : > { %v2891_v43 = vsel %vm2881_vm5, %v2890_v38, %v2864_v35 }
 0x38c   : > { %v2840_v40 = vpop.permute.xlu0 %2839  ;;  %v2868_v41 = vpop.permute.xlu1 %2867  ;;  %v3023_v36 = vcombine.high %v5102_v30, %v5105_v31 }
 0x38d   : > { %v2884_v47 = vsel %vm2883_vm6, %v2882_v44, %v2840_v40  ;;  %v2892_v46 = vsel %vm2883_vm6, %v2891_v43, %v2868_v41  ;;  %v2911_v41 = vcombine.high %v4241_v10, %v4242_v60  ;;  %v2909_v43 = vrot.slane %v2895_v37, %v4937_v9  ;;  %v4249_v44 = vld [vmem:[%s4699_s25 + $0x40] sm:$0xff] }
 0x38e   : > { %3167 = vrot.lane.b32.xlu1 %v3023_v36, %s4423_s26  ;;  %v3022_v10 = vcombine.low %v5102_v30, %v5105_v31 }
 0x390   : > { %v2844_v56 = vpop.permute.xlu0 %2843  ;;  %v2872_v58 = vpop.permute.xlu1 %2871 }
 0x391   : > { %v2886_v59 = vsel %vm2885_vm7, %v2884_v47, %v2844_v56  ;;  %v2893_v62 = vsel %vm2885_vm7, %v2892_v46, %v2872_v58  ;;  %v4250_v47 = vld [vmem:[%s4699_s25 + $0x60] sm:$0xff]  ;;  %v4251_v56 = vld [vmem:[%s4699_s25 + $0x50] sm:$0xff] }
 0x392   : > { %v3242_v63 = vmul.f32 %v4935_v57, %v2886_v59  ;;  %v3243_v0 = vmul.f32 %v4935_v57, %v2893_v62  ;;  %v3253_v57 = vld [vmem:[%s5256_s30 + $0x8] sm:$0xff]  ;;  %v2927_v46 = vcombine.high %v4249_v44, %v4250_v47  ;;  %v4252_v58 = vld [vmem:[%s4699_s25 + $0x70] sm:$0xff]  ;;  %v3031_v62 = vcombine.high %v4243_v14, %v4244_v16  ;;  %3171 = vrot.lane.b32.xlu1 %v3024_v39, %s4425_s21 }
 0x393   : > { %v2943_v59 = vcombine.high %v4251_v56, %v4252_v58  ;;  %v3025_v14 = vcombine.high %v2973_v32, %v3005_v33 }
 0x394   : > { %v3250_v1 = vadd.f32 %v3248_v19, %v3242_v63  ;;  %v3251_v2 = vadd.f32 %v3248_v19, %v3243_v0  ;;  %v3086_v19 = vrot.slane %v3078_v48, %v4937_v9  ;;  %v2925_v63 = vrot.slane %v2911_v41, %v4937_v9 }
 0x395   : > { %v2941_v5 = vrot.slane %v2927_v46, %v4937_v9  ;;  %v2957_v6 = vrot.slane %v2943_v59, %v4937_v9  ;;  %v3045_v8 = vrot.slane %v3031_v62, %v4937_v9 }
 0x396   : > { %3273 = vmatprep.subr.mxu0 %v3251_v2  ;;  %v3126_v23 = vcombine.low %v3070_v55, %v3086_v19  ;;  %v3127_v27 = vcombine.high %v3070_v55, %v3086_v19  ;;  %v2974_v60 = vcombine.low %v2909_v43, %v2925_v63  ;;  %3175 = vrot.lane.b32.xlu1 %v3025_v14, %s4422_s11 }
 0x397   : > { %3274 = vmatpush1.msra.mxu0 %v3250_v1  ;;  %v4253_v1 = vld [vmem:[%s4699_s25 + $0x68] sm:$0xff]  ;;  %v3006_v16 = vcombine.low %v2941_v5, %v2957_v6  ;;  %v2975_v51 = vcombine.high %v2909_v43, %v2925_v63  ;;  %v3007_v52 = vcombine.high %v2941_v5, %v2957_v6 }
 0x398   : > { %3647 = vmatmul.mubr.msk.f32.vlgmr.msra.gmra.mrb[32].mxu0 %vm3266_vm8, %v3252_v4  ;;  %v5113_v50 = vrot.slane %v3126_v23, %v4956_v7  ;;  %v3141_v35 = vrot.slane %v3127_v27, %v4956_v7  ;;  %v3063_v2 = vcombine.high %v4247_v53, %v4253_v1  ;;  %v4254_v4 = vld [vmem:[%s4699_s25 + $0x78] sm:$0xff] }
 0x399   : > { %3343 = vmatprep.mubr.f32.mxu0 %v4427_v42  ;;  %v4245_v42 = vld [vmem:[%s4699_s25 + $0x18] sm:$0xff]  ;;  %v3014_v17 = vrot.slane %v3006_v16, %v4956_v7  ;;  %s5257_s25 = smov 64   ;;  %v2989_v55 = vrot.slane %v2975_v51, %v4956_v7  ;;  %v3021_v19 = vrot.slane %v3007_v52, %v4956_v7 }
 0x39a   : > { %v3046_v49 = vcombine.low %v4245_v42, %v4246_v61  ;;  %v3047_v0 = vcombine.high %v4245_v42, %v4246_v61  ;;  %v3077_v12 = vrot.slane %v3063_v2, %v4937_v9  ;;  %v2982_v61 = vrot.slane %v2974_v60, %v4956_v7 }
 0x39b   : > { %v3028_v29 = vcombine.low %v2989_v55, %v3021_v19  ;;  %v3029_v23 = vcombine.high %v2989_v55, %v3021_v19 }
 0x39c   : > { %3648 = vmatmul.mubr.msk.f32.gmra.mrb[34].mxu0 %vm3266_vm8, %v3253_v57  ;;  %v3054_v28 = vrot.slane %v3046_v49, %v4937_v9  ;;  %v3079_v57 = vcombine.high %v4248_v3, %v4254_v4  ;;  %v3061_v11 = vrot.slane %v3047_v0, %v4937_v9  ;;  %v3026_v48 = vcombine.low %v2982_v61, %v3014_v17 }
 0x39e   : > { %v3094_v22 = vcombine.low %v3038_v25, %v3054_v28  ;;  %v3095_v24 = vcombine.high %v3038_v25, %v3054_v28  ;;  %v3093_v13 = vrot.slane %v3079_v57, %v4937_v9  ;;  %v3110_v49 = vcombine.low %v3045_v8, %v3061_v11  ;;  %3179 = vrot.lane.b32.xlu1 %v3026_v48, %s5257_s25 }
 0x39f   : > { %v3111_v18 = vcombine.high %v3045_v8, %v3061_v11  ;;  %v3027_v28 = vcombine.high %v2982_v61, %v3014_v17  ;;  %v3386_v8 = vld [vmem:[%s5261_s18] sm:$0xff] }
 0x3a0   : > { %v5110_v34 = vrot.slane %v3094_v22, %v4956_v7  ;;  %v3109_v54 = vrot.slane %v3095_v24, %v4956_v7  ;;  %v3142_v53 = vcombine.low %v3077_v12, %v3093_v13  ;;  %v3118_v3 = vrot.slane %v3110_v49, %v4956_v7 }
 0x3a1   : > { %v3143_v25 = vcombine.high %v3077_v12, %v3093_v13  ;;  %v3125_v20 = vrot.slane %v3111_v18, %v4956_v7  ;;  %v3259_v27 = vpop.permute.xlu1 %3258  ;;  %v3264_v33 = vpop.permute.xlu0 %3263 }
 0x3a2   : > { %v3159_v38 = vcombine.high %v5110_v34, %v5113_v50  ;;  %v3160_v40 = vcombine.low %v3109_v54, %v3141_v35  ;;  %v3158_v45 = vcombine.low %v5110_v34, %v5113_v50  ;;  %v3161_v42 = vcombine.high %v3109_v54, %v3141_v35 }
 0x3a3   : > { %v3150_v9 = vrot.slane %v3142_v53, %v4956_v7  ;;  %v3157_v21 = vrot.slane %v3143_v25, %v4956_v7 }
 0x3a4   : > { %3195 = vrot.lane.b32.xlu0 %v3159_v38, %s4423_s26  ;;  %s5258_s26 = smov 80  }
 0x3a5   : > { %v3162_v15 = vcombine.low %v3118_v3, %v3150_v9  ;;  %v3163_v26 = vcombine.high %v3118_v3, %v3150_v9  ;;  %3183 = vrot.lane.b32.xlu1 %v3027_v28, %s5258_s26  ;;  %v3164_v22 = vcombine.low %v3125_v20, %v3157_v21  ;;  %v3165_v24 = vcombine.high %v3125_v20, %v3157_v21  ;;  %v3355_v32 = vpop.permute.xlu1 %3354  ;;  %v3371_v44 = vpop.permute.xlu0 %3370 }
 0x3a8   : > { %3199 = vrot.lane.b32.xlu0 %v3160_v40, %s4425_s21  ;;  %s5260_s21 = smov 112  }
 0x3a9   : > { %v3360_v36 = vpop.permute.xlu1 %3359  ;;  %v3391_v60 = vpop.permute.xlu0 %3390 }
 0x3ac   : > { %3203 = vrot.lane.b32.xlu0 %v3161_v42, %s4422_s11  ;;  %s5259_s11 = smov 96  }
 0x3ad   : > { %3187 = vrot.lane.b32.xlu1 %v3028_v29, %s5259_s11  ;;  %v3376_v58 = vpop.permute.xlu1 %3375  ;;  %v3479_v12 = vpop.permute.xlu0 %3478 }
 0x3b0   : > { %3207 = vrot.lane.b32.xlu0 %v3162_v15, %s5257_s25 }
 0x3b1   : > { %3191 = vrot.lane.b32.xlu1 %v3029_v23, %s5260_s21  ;;  %v3471_v11 = vpop.permute.xlu1 %3470 }
 0x3b4   : > { %3211 = vrot.lane.b32.xlu0 %v3163_v26, %s5258_s26 }
 0x3b8   : > { %3215 = vrot.lane.b32.xlu0 %v3164_v22, %s5259_s11 }
 0x3bc   : > { %3219 = vrot.lane.b32.xlu0 %v3165_v24, %s5260_s21 }
 0x400   : > { %v3168_v13 = vpop.permute.xlu1 %3167 }
 0x401   : > { %v3222_v3 = vsel %vm591_vm0, %v3022_v10, %v3168_v13 }
 0x404   : > { %v3172_v16 = vpop.permute.xlu1 %3171 }
 0x405   : > { %v3223_v48 = vsel %vm2875_vm2, %v3222_v3, %v3172_v16 }
 0x408   : > { %v3176_v61 = vpop.permute.xlu1 %3175 }
 0x409   : > { %v3224_v18 = vsel %vm2877_vm3, %v3223_v48, %v3176_v61 }
 0x410   : > { %v3180_v53 = vpop.permute.xlu1 %3179 }
 0x411   : > { %v3225_v30 = vsel %vm2879_vm4, %v3224_v18, %v3180_v53 }
 0x416   : > { %v3196_v14 = vpop.permute.xlu0 %3195 }
 0x417   : > { %v3229_v9 = vsel %vm591_vm0, %v3158_v45, %v3196_v14  ;;  %v3184_v51 = vpop.permute.xlu1 %3183 }
 0x418   : > { %v3226_v34 = vsel %vm2881_vm5, %v3225_v30, %v3184_v51 }
 0x41a   : > { %v3200_v42 = vpop.permute.xlu0 %3199 }
 0x41b   : > { %v3230_v52 = vsel %vm2875_vm2, %v3229_v9, %v3200_v42 }
 0x41e   : > { %v3204_v49 = vpop.permute.xlu0 %3203 }
 0x41f   : > { %v3231_v25 = vsel %vm2877_vm3, %v3230_v52, %v3204_v49  ;;  %v3188_v31 = vpop.permute.xlu1 %3187 }
 0x420   : > { %v3227_v21 = vsel %vm2883_vm6, %v3226_v34, %v3188_v31 }
 0x422   : > { %v3208_v17 = vpop.permute.xlu0 %3207 }
 0x423   : > { %v3232_v10 = vsel %vm2879_vm4, %v3231_v25, %v3208_v17  ;;  %v3192_v29 = vpop.permute.xlu1 %3191 }
 0x426   : > { %v3212_v15 = vpop.permute.xlu0 %3211 }
 0x427   : > { %v3233_v45 = vsel %vm2881_vm5, %v3232_v10, %v3212_v15 }
 0x42a   : > { %v3216_v28 = vpop.permute.xlu0 %3215 }
 0x42b   : > { %v3234_v23 = vsel %vm2883_vm6, %v3233_v45, %v3216_v28 }
 0x42e   : > { %v3220_v24 = vpop.permute.xlu0 %3219 }
 0x46b   : > { %v3339_v7 = vpop.f32.mrb[32].mxu0 }
 0x46c   : > { %v3340_v54 = vadd.f32 %v3339_v7, %v3259_v27  ;;  %v3341_v35 = vpop.f32.mrb[33].mxu0 }
 0x46d   : > { %v3342_v37 = vadd.f32 %v3341_v35, %v3259_v27 }
 0x46e   : > { %v3362_v38 = vmul.f32 %v3355_v32, %v3340_v54  ;;  %v3235_v54 = vsel %vm2885_vm7, %v3234_v23, %v3220_v24 }
 0x46f   : > { %v3363_v39 = vmul.f32 %v3355_v32, %v3342_v37  ;;  %v3345_v40 = vpop.f32.mrb[34].mxu0 }
 0x470   : > { %v3346_v41 = vadd.f32 %v3345_v40, %v3264_v33  ;;  %v3347_v43 = vpop.f32.mrb[35].mxu0  ;;  %v3378_v46 = vadd.f32 %v3371_v44, %v3362_v38 }
 0x471   : > { %v3348_v47 = vadd.f32 %v3347_v43, %v3264_v33  ;;  %v3379_v59 = vadd.f32 %v3371_v44, %v3363_v39  ;;  %v3228_v33 = vsel %vm2885_vm7, %v3227_v21, %v3192_v29 }
 0x472   : > { %v3364_v56 = vmul.f32 %v3360_v36, %v3346_v41  ;;  %v3382_v1 = vmax.f32 %v3378_v46, 0.0 }
 0x473   : > { %v3365_v62 = vmul.f32 %v3360_v36, %v3348_v47  ;;  %v3383_v4 = vmax.f32 %v3379_v59, 0.0 }
 0x474   : > { %v3380_v63 = vadd.f32 %v3376_v58, %v3364_v56 }
 0x475   : > { %v3381_v0 = vadd.f32 %v3376_v58, %v3365_v62 }
 0x476   : > { %v3384_v2 = vmax.f32 %v3380_v63, 0.0 }
 0x477   : > { %v3385_v57 = vmax.f32 %v3381_v0, 0.0 }
 0x478   : > { %v4152_v5 = vpack.c.bf16 %v3384_v2, %v3382_v1 }
 0x479   : > { %v4150_v6 = vpack.c.bf16 %v3385_v57, %v3383_v4 }
 0x47b   : > { %4151 = vmatprep.subr.bf16.mxu1 %v4150_v6 }
 0x47c   : > { %4153 = vmatpush1.bf16.msra.mxu1 %v4152_v5 }
 0x47f   : > { %3649 = vmatmul.mubr.msk.f32.vlgmr.msra.gmra.mrb[32].mxu1 %vm591_vm0, %v3386_v8 }
 0x552   : > { %v3462_v50 = vpop.f32.mrb[32].mxu1 }
 0x553   : > { %v3463_v55 = vadd.f32 %v3462_v50, %v3391_v60  ;;  %v3464_v19 = vpop.f32.mrb[33].mxu1 }
 0x554   : > { %v3465_v26 = vadd.f32 %v3464_v19, %v3391_v60 }
 0x555   : > { %v3473_v20 = vmul.f32 %v3471_v11, %v3463_v55 }
 0x556   : > { %v3474_v22 = vmul.f32 %v3471_v11, %v3465_v26 }
 0x557   : > { %v3481_v27 = vadd.f32 %v3479_v12, %v3473_v20 }
 0x558   : > { %v3482_v32 = vadd.f32 %v3479_v12, %v3474_v22 }
 0x559   : > { %v3483_v7 = vadd.f32 %v3481_v27, %v3228_v33 }
 0x55a   : > { %v3484_v35 = vadd.f32 %v3482_v32, %v3235_v54 }
 0x55b   : > { %3485 = vst [vmem:[%s558_s29] sm:$0xff] %v3483_v7 }
 0x55c   : > { %3486 = vst [vmem:[%s558_s29 + $0x8] sm:$0xff] %v3484_v35 }
 0x55d PF: > { %p27_p9 = scmp.ge.s32.totalorder %s4640_s7, 4   ;;  %s5263_s18 = smov %s4403_s19 }
 0x55e   : > { %s5264_s19 = smov %s4407_s20  ;;  %s5265_s20 = smov %s4650_s13 }
 0x55f   : > { %s5266_s21 = smov %s4640_s7  ;;  %29 = sbr.rel (!%p27_p9) target bundleno = 13 (0xd), region = 132 }
 0x566   :  { %3508 = vsyncpa [#allocation3], 1 }
 0x567   :  { %3510 = vsyncpa [#allocation3 + $0x1], 1 }
 0x568   :  { %3511 = vsyncpa [#allocation5], 1 }
 0x569   :  { %3512 = vsyncpa [#allocation8], 1 }

</bundles_post_ra>
